<compile_context>
chip_gen: v6e
topology: v6e:2x2x1
jax: 0.10.0
libtpu: 0.0.40
codegen_flags: <defaults>
</compile_context>

<pallas_src>
import functools

import jax
import jax.numpy as jnp
from jax import lax
from jax.experimental import pallas as pl
from jax.experimental.pallas import tpu as pltpu


def gru_classifier_kernel(
    x_ref, lens_ref,
    w_i_ref, w_h_ref, b_x_ref, b_hn_ref,
    w1_ref, b1_ref, w2_ref, b2_ref, w3_ref, b3_ref,
    out_ref,
    gx_ref,
    *, T, B, H,
):
    # ---- hoisted input projection: one (T*B, E) @ (E, 3H) matmul ----------
    gx_ref[...] = (
        jnp.dot(x_ref[...], w_i_ref[...], preferred_element_type=jnp.float32)
        + b_x_ref[...]
    )

    w_h = w_h_ref[...]                                   # (H, 3H), loop-resident
    b_hn = b_hn_ref[...]                                 # (1, H)
    lens_bh = jnp.broadcast_to(lens_ref[...], (B, H))    # hoisted broadcast

    # ---- sequential GRU recurrence (PyTorch gate order r, z, n) -----------
    def step(t, h):
        start = pl.multiple_of(t * B, B)
        gx_t = gx_ref[pl.ds(start, B), :]                # (B, 3H) precomputed x-proj
        gh = jnp.dot(h, w_h, preferred_element_type=jnp.float32)  # (B, 3H)
        r = jax.nn.sigmoid(gx_t[:, 0:H] + gh[:, 0:H])
        z = jax.nn.sigmoid(gx_t[:, H:2 * H] + gh[:, H:2 * H])
        n = jnp.tanh(gx_t[:, 2 * H:3 * H] + r * (gh[:, 2 * H:3 * H] + b_hn))
        h_new = n + z * (h - n)                          # == (1-z)*n + z*h
        # Freeze past each sequence's true length (== pack_padded_sequence).
        return jnp.where(t < lens_bh, h_new, h)

    h0 = jnp.zeros((B, H), jnp.float32)
    hf = lax.fori_loop(0, T, step, h0, unroll=True)

    # ---- classifier: Linear -> LeakyReLU -> Linear -> LeakyReLU -> Linear --
    # TODO(synk): dropout layers are identity here (inference-mode forward).
    a1 = jnp.dot(hf, w1_ref[...], preferred_element_type=jnp.float32) + b1_ref[...]
    a1 = jnp.where(a1 > 0, a1, 0.01 * a1)                # LeakyReLU(0.01)
    a2 = jnp.dot(a1, w2_ref[...], preferred_element_type=jnp.float32) + b2_ref[...]
    a2 = jnp.where(a2 > 0, a2, 0.01 * a2)
    out_ref[...] = (
        jnp.dot(a2, w3_ref[...], preferred_element_type=jnp.float32) + b3_ref[...]
    ).astype(out_ref.dtype)


def sentiment_forward(embeds, seq_lens, params):
    """embeds: (B, T, E) float32, seq_lens: (B,) int32 -> logits (B, 2)."""
    B, T, E = embeds.shape
    H = params["w_hr"].shape[0]
    Bp = max(8, ((B + 7) // 8) * 8)          # pad batch to a full sublane group

    # Fused gate weights/biases (gate order r, z, n — matches torch.nn.GRU).
    w_i = jnp.concatenate([params["w_ir"], params["w_iz"], params["w_in"]], axis=1)  # (E,3H)
    w_h = jnp.concatenate([params["w_hr"], params["w_hz"], params["w_hn"]], axis=1)  # (H,3H)
    b_x = jnp.concatenate([params["b_r"], params["b_z"], params["b_in"]], axis=1)    # (1,3H)
    b_hn = params["b_hn"]                                                            # (1,H)

    # Time-major, batch-padded, flattened to (T*Bp, E) rows for the hoisted matmul.
    x_tbe = jnp.transpose(embeds, (1, 0, 2)).astype(jnp.float32)      # (T, B, E)
    x_tbe = jnp.pad(x_tbe, ((0, 0), (0, Bp - B), (0, 0)))
    x2 = x_tbe.reshape(T * Bp, E)

    lens = jnp.pad(seq_lens.astype(jnp.int32), (0, Bp - B)).reshape(Bp, 1)

    weight_args = [w_i, w_h, b_x, b_hn,
                   params["w1"], params["b1"], params["w2"], params["b2"],
                   params["w3"], params["b3"]]

    def full_spec(arr):
        nd = arr.ndim
        return pl.BlockSpec(arr.shape, lambda i, _nd=nd: (0,) * _nd)

    in_specs = [full_spec(x2), full_spec(lens)] + [full_spec(w) for w in weight_args]
    out_spec = pl.BlockSpec((Bp, 2), lambda i: (0, 0))

    grid_spec = pltpu.PrefetchScalarGridSpec(
        num_scalar_prefetch=0,
        grid=(1,),
        in_specs=in_specs,
        out_specs=out_spec,
        scratch_shapes=[pltpu.VMEM((T * Bp, 3 * H), jnp.float32)],
    )

    kern = functools.partial(gru_classifier_kernel, T=T, B=Bp, H=H)

    out = pl.pallas_call(
        kern,
        out_shape=jax.ShapeDtypeStruct((Bp, 2), jnp.float32),
        grid_spec=grid_spec,
        compiler_params=pltpu.CompilerParams(
            dimension_semantics=("arbitrary",)),
    )(x2, lens, *weight_args)
    return out[:B]


def ref_forward(embeds, seq_lens, params):
    """Pure-JAX reference of the same forward pass (masked GRU + MLP)."""
    B, T, E = embeds.shape
    H = params["w_hr"].shape[0]
    h = jnp.zeros((B, H), jnp.float32)
    for t in range(T):
        x_t = embeds[:, t, :]
        r = jax.nn.sigmoid(x_t @ params["w_ir"] + h @ params["w_hr"] + params["b_r"])
        z = jax.nn.sigmoid(x_t @ params["w_iz"] + h @ params["w_hz"] + params["b_z"])
        n = jnp.tanh(x_t @ params["w_in"] + params["b_in"]
                     + r * (h @ params["w_hn"] + params["b_hn"]))
        h_new = (1.0 - z) * n + z * h
        m = (t < seq_lens).astype(jnp.float32)[:, None]
        h = m * h_new + (1.0 - m) * h
    leaky = lambda a: jnp.where(a > 0, a, 0.01 * a)
    a1 = leaky(h @ params["w1"] + params["b1"])
    a2 = leaky(a1 @ params["w2"] + params["b2"])
    return a2 @ params["w3"] + params["b3"]


def init_params(key, embed_size, hidden_sz, interm1=256, interm2=64, num_outputs=2):
    ks = jax.random.split(key, 16)
    s_rnn = 1.0 / jnp.sqrt(hidden_sz)

    def u(k, shape, scale):
        return jax.random.uniform(k, shape, jnp.float32, -scale, scale)

    p = {
        # GRU weights stored transposed ((in, out)) so the kernel does x @ W.
        "w_ir": u(ks[0], (embed_size, hidden_sz), s_rnn),
        "w_iz": u(ks[1], (embed_size, hidden_sz), s_rnn),
        "w_in": u(ks[2], (embed_size, hidden_sz), s_rnn),
        "w_hr": u(ks[3], (hidden_sz, hidden_sz), s_rnn),
        "w_hz": u(ks[4], (hidden_sz, hidden_sz), s_rnn),
        "w_hn": u(ks[5], (hidden_sz, hidden_sz), s_rnn),
        # b_r/b_z fold b_ih + b_hh (valid because they add before the sigmoid);
        # the n-gate biases must stay separate (b_hn sits inside r * (...)).
        "b_r": u(ks[6], (1, hidden_sz), s_rnn),
        "b_z": u(ks[7], (1, hidden_sz), s_rnn),
        "b_in": u(ks[8], (1, hidden_sz), s_rnn),
        "b_hn": u(ks[9], (1, hidden_sz), s_rnn),
        # Classifier (Linear weights transposed to (in, out)); biases kept 2-D.
        "w1": u(ks[10], (hidden_sz, interm1), 1.0 / jnp.sqrt(hidden_sz)),
        "b1": u(ks[11], (1, interm1), 1.0 / jnp.sqrt(hidden_sz)),
        "w2": u(ks[12], (interm1, interm2), 1.0 / jnp.sqrt(interm1)),
        "b2": u(ks[13], (1, interm2), 1.0 / jnp.sqrt(interm1)),
        "w3": u(ks[14], (interm2, num_outputs), 1.0 / jnp.sqrt(interm2)),
        "b3": u(ks[15], (1, num_outputs), 1.0 / jnp.sqrt(interm2)),
    }
    return p


if __name__ == "__main__":
    B, T, E, H, V = 2, 8, 32, 32, 50

    key = jax.random.PRNGKey(0)
    k_tok, k_emb, k_par = jax.random.split(key, 3)

    tokens = jax.random.randint(k_tok, (B, T), 0, V, dtype=jnp.int32)
    seq_lens = jnp.array([8, 5], dtype=jnp.int32)

    # Embedding lookup (glue; the 'embedding_lookup' module of the reference).
    embed_table = jax.random.normal(k_emb, (V, E), jnp.float32) * 0.1
    embeds = jnp.take(embed_table, tokens, axis=0)         # (B, T, E)

    params = init_params(k_par, E, H)

    logits = sentiment_forward(embeds, seq_lens, params)
    logits = jax.block_until_ready(logits)

    ref = ref_forward(embeds, seq_lens, params)
    assert logits.shape == (B, 2)
    assert jnp.allclose(logits, ref, rtol=1e-4, atol=1e-4), (logits, ref)

    print("KERNEL_OK")
</pallas_src>

<mosaic_0001>
module attributes {stable_mosaic.version = 11 : i64} {
  func.func @gru_classifier_kernel(%arg0: i32, %arg1: memref<64x32xf32, #tpu.memory_space<vmem>>, %arg2: memref<8x1xi32, #tpu.memory_space<vmem>>, %arg3: memref<32x96xf32, #tpu.memory_space<vmem>>, %arg4: memref<32x96xf32, #tpu.memory_space<vmem>>, %arg5: memref<1x96xf32, #tpu.memory_space<vmem>>, %arg6: memref<1x32xf32, #tpu.memory_space<vmem>>, %arg7: memref<32x256xf32, #tpu.memory_space<vmem>>, %arg8: memref<1x256xf32, #tpu.memory_space<vmem>>, %arg9: memref<256x64xf32, #tpu.memory_space<vmem>>, %arg10: memref<1x64xf32, #tpu.memory_space<vmem>>, %arg11: memref<64x2xf32, #tpu.memory_space<vmem>>, %arg12: memref<1x2xf32, #tpu.memory_space<vmem>>, %arg13: memref<8x2xf32, #tpu.memory_space<vmem>>, %arg14: memref<64x96xf32, #tpu.memory_space<vmem>>) attributes {dimension_semantics = [#tpu.dimension_semantics<arbitrary>], iteration_bounds = array<i64: 1>, scalar_prefetch = 0 : i64, scratch_operands = 1 : i64, tpu.core_type = #tpu.core_type<tc>, window_params = [{pipeline_mode = #tpu.pipeline_mode<synchronous>, transform_indices = @transform_0, window_bounds = array<i64: 64, 32>}, {pipeline_mode = #tpu.pipeline_mode<synchronous>, transform_indices = @transform_1, window_bounds = array<i64: 8, 1>}, {pipeline_mode = #tpu.pipeline_mode<synchronous>, transform_indices = @transform_2, window_bounds = array<i64: 32, 96>}, {pipeline_mode = #tpu.pipeline_mode<synchronous>, transform_indices = @transform_3, window_bounds = array<i64: 32, 96>}, {pipeline_mode = #tpu.pipeline_mode<synchronous>, transform_indices = @transform_4, window_bounds = array<i64: 1, 96>}, {pipeline_mode = #tpu.pipeline_mode<synchronous>, transform_indices = @transform_5, window_bounds = array<i64: 1, 32>}, {pipeline_mode = #tpu.pipeline_mode<synchronous>, transform_indices = @transform_6, window_bounds = array<i64: 32, 256>}, {pipeline_mode = #tpu.pipeline_mode<synchronous>, transform_indices = @transform_7, window_bounds = array<i64: 1, 256>}, {pipeline_mode = #tpu.pipeline_mode<synchronous>, transform_indices = @transform_8, window_bounds = array<i64: 256, 64>}, {pipeline_mode = #tpu.pipeline_mode<synchronous>, transform_indices = @transform_9, window_bounds = array<i64: 1, 64>}, {pipeline_mode = #tpu.pipeline_mode<synchronous>, transform_indices = @transform_10, window_bounds = array<i64: 64, 2>}, {pipeline_mode = #tpu.pipeline_mode<synchronous>, transform_indices = @transform_11, window_bounds = array<i64: 1, 2>}, {pipeline_mode = #tpu.pipeline_mode<synchronous>, transform_indices = @transform_12, window_bounds = array<i64: 8, 2>}]} {
    %c0 = arith.constant 0 : index
    %c0_0 = arith.constant 0 : index
    %0 = vector.load %arg1[%c0, %c0_0] : memref<64x32xf32, #tpu.memory_space<vmem>>, vector<64x32xf32>
    %c0_1 = arith.constant 0 : index
    %c0_2 = arith.constant 0 : index
    %1 = vector.load %arg3[%c0_1, %c0_2] : memref<32x96xf32, #tpu.memory_space<vmem>>, vector<32x96xf32>
    %cst = arith.constant dense<0.000000e+00> : vector<64x96xf32>
    %2 = tpu.matmul %0, %1, %cst {dimension_numbers = #tpu.dot_dimension_numbers<[1], [0], [0], [1], [0, 0, 1, 1], [], []>} : vector<64x32xf32>, vector<32x96xf32>, vector<64x96xf32> -> vector<64x96xf32>
    %c0_3 = arith.constant 0 : index
    %c0_4 = arith.constant 0 : index
    %3 = vector.load %arg5[%c0_3, %c0_4] : memref<1x96xf32, #tpu.memory_space<vmem>>, vector<1x96xf32>
    %4 = vector.broadcast %3 : vector<1x96xf32> to vector<64x96xf32>
    %5 = arith.addf %2, %4 : vector<64x96xf32>
    %c0_5 = arith.constant 0 : index
    %c0_6 = arith.constant 0 : index
    %6 = vector.load %arg14[%c0_5, %c0_6] : memref<64x96xf32, #tpu.memory_space<vmem>>, vector<64x96xf32>
    tpu.vector_store %arg14[%c0_5, %c0_6], %5 {strides = array<i32>} : memref<64x96xf32, #tpu.memory_space<vmem>>, vector<64x96xf32>,
    %c0_7 = arith.constant 0 : index
    %c0_8 = arith.constant 0 : index
    %7 = vector.load %arg4[%c0_7, %c0_8] : memref<32x96xf32, #tpu.memory_space<vmem>>, vector<32x96xf32>
    %c0_9 = arith.constant 0 : index
    %c0_10 = arith.constant 0 : index
    %8 = vector.load %arg6[%c0_9, %c0_10] : memref<1x32xf32, #tpu.memory_space<vmem>>, vector<1x32xf32>
    %c0_11 = arith.constant 0 : index
    %c0_12 = arith.constant 0 : index
    %9 = vector.load %arg2[%c0_11, %c0_12] : memref<8x1xi32, #tpu.memory_space<vmem>>, vector<8x1xi32>
    %10 = vector.shape_cast %9 : vector<8x1xi32> to vector<8x1xi32>
    %11 = vector.broadcast %10 : vector<8x1xi32> to vector<8x32xi32>
    %cst_13 = arith.constant 0.000000e+00 : f32
    %12 = vector.broadcast %cst_13 : f32 to vector<8x32xf32>
    %c0_i32 = arith.constant 0 : i32
    %c8_i32 = arith.constant 8 : i32
    %13 = arith.muli %c0_i32, %c8_i32 : i32
    %14 = tpu.assume_multiple %13, 8 : i32
    %15 = arith.index_cast %14 : i32 to index
    %c0_14 = arith.constant 0 : index
    %16 = vector.load %arg14[%15, %c0_14] : memref<64x96xf32, #tpu.memory_space<vmem>>, vector<8x96xf32>
    %cst_15 = arith.constant dense<0.000000e+00> : vector<8x96xf32>
    %17 = tpu.matmul %12, %7, %cst_15 {dimension_numbers = #tpu.dot_dimension_numbers<[1], [0], [0], [1], [0, 0, 1, 1], [], []>} : vector<8x32xf32>, vector<32x96xf32>, vector<8x96xf32> -> vector<8x96xf32>
    %18 = vector.extract_strided_slice %16 {offsets = [0, 0], sizes = [8, 32], strides = [1, 1]} : vector<8x96xf32> to vector<8x32xf32>
    %19 = vector.extract_strided_slice %17 {offsets = [0, 0], sizes = [8, 32], strides = [1, 1]} : vector<8x96xf32> to vector<8x32xf32>
    %20 = arith.addf %18, %19 : vector<8x32xf32>
    %21 = arith.negf %20 : vector<8x32xf32>
    %22 = math.exp %21 : vector<8x32xf32>
    %cst_16 = arith.constant 1.000000e+00 : f32
    %23 = vector.broadcast %cst_16 : f32 to vector<8x32xf32>
    %24 = arith.addf %23, %22 : vector<8x32xf32>
    %25 = arith.divf %23, %24 : vector<8x32xf32>
    %26 = vector.extract_strided_slice %16 {offsets = [0, 32], sizes = [8, 32], strides = [1, 1]} : vector<8x96xf32> to vector<8x32xf32>
    %27 = vector.extract_strided_slice %17 {offsets = [0, 32], sizes = [8, 32], strides = [1, 1]} : vector<8x96xf32> to vector<8x32xf32>
    %28 = arith.addf %26, %27 : vector<8x32xf32>
    %29 = arith.negf %28 : vector<8x32xf32>
    %30 = math.exp %29 : vector<8x32xf32>
    %cst_17 = arith.constant 1.000000e+00 : f32
    %31 = vector.broadcast %cst_17 : f32 to vector<8x32xf32>
    %32 = arith.addf %31, %30 : vector<8x32xf32>
    %33 = arith.divf %31, %32 : vector<8x32xf32>
    %34 = vector.extract_strided_slice %16 {offsets = [0, 64], sizes = [8, 32], strides = [1, 1]} : vector<8x96xf32> to vector<8x32xf32>
    %35 = vector.extract_strided_slice %17 {offsets = [0, 64], sizes = [8, 32], strides = [1, 1]} : vector<8x96xf32> to vector<8x32xf32>
    %36 = vector.broadcast %8 : vector<1x32xf32> to vector<8x32xf32>
    %37 = arith.addf %35, %36 : vector<8x32xf32>
    %38 = arith.mulf %25, %37 : vector<8x32xf32>
    %39 = arith.addf %34, %38 : vector<8x32xf32>
    %40 = math.tanh %39 : vector<8x32xf32>
    %41 = arith.subf %12, %40 : vector<8x32xf32>
    %42 = arith.mulf %33, %41 : vector<8x32xf32>
    %43 = arith.addf %40, %42 : vector<8x32xf32>
    %44 = vector.broadcast %c0_i32 : i32 to vector<8x32xi32>
    %45 = arith.cmpi slt, %44, %11 : vector<8x32xi32>
    %46 = arith.select %45, %43, %12 : vector<8x32xi1>, vector<8x32xf32>
    %c1_i32 = arith.constant 1 : i32
    %c8_i32_18 = arith.constant 8 : i32
    %47 = arith.muli %c1_i32, %c8_i32_18 : i32
    %48 = tpu.assume_multiple %47, 8 : i32
    %49 = arith.index_cast %48 : i32 to index
    %c0_19 = arith.constant 0 : index
    %50 = vector.load %arg14[%49, %c0_19] : memref<64x96xf32, #tpu.memory_space<vmem>>, vector<8x96xf32>
    %cst_20 = arith.constant dense<0.000000e+00> : vector<8x96xf32>
    %51 = tpu.matmul %46, %7, %cst_20 {dimension_numbers = #tpu.dot_dimension_numbers<[1], [0], [0], [1], [0, 0, 1, 1], [], []>} : vector<8x32xf32>, vector<32x96xf32>, vector<8x96xf32> -> vector<8x96xf32>
    %52 = vector.extract_strided_slice %50 {offsets = [0, 0], sizes = [8, 32], strides = [1, 1]} : vector<8x96xf32> to vector<8x32xf32>
    %53 = vector.extract_strided_slice %51 {offsets = [0, 0], sizes = [8, 32], strides = [1, 1]} : vector<8x96xf32> to vector<8x32xf32>
    %54 = arith.addf %52, %53 : vector<8x32xf32>
    %55 = arith.negf %54 : vector<8x32xf32>
    %56 = math.exp %55 : vector<8x32xf32>
    %cst_21 = arith.constant 1.000000e+00 : f32
    %57 = vector.broadcast %cst_21 : f32 to vector<8x32xf32>
    %58 = arith.addf %57, %56 : vector<8x32xf32>
    %59 = arith.divf %57, %58 : vector<8x32xf32>
    %60 = vector.extract_strided_slice %50 {offsets = [0, 32], sizes = [8, 32], strides = [1, 1]} : vector<8x96xf32> to vector<8x32xf32>
    %61 = vector.extract_strided_slice %51 {offsets = [0, 32], sizes = [8, 32], strides = [1, 1]} : vector<8x96xf32> to vector<8x32xf32>
    %62 = arith.addf %60, %61 : vector<8x32xf32>
    %63 = arith.negf %62 : vector<8x32xf32>
    %64 = math.exp %63 : vector<8x32xf32>
    %cst_22 = arith.constant 1.000000e+00 : f32
    %65 = vector.broadcast %cst_22 : f32 to vector<8x32xf32>
    %66 = arith.addf %65, %64 : vector<8x32xf32>
    %67 = arith.divf %65, %66 : vector<8x32xf32>
    %68 = vector.extract_strided_slice %50 {offsets = [0, 64], sizes = [8, 32], strides = [1, 1]} : vector<8x96xf32> to vector<8x32xf32>
    %69 = vector.extract_strided_slice %51 {offsets = [0, 64], sizes = [8, 32], strides = [1, 1]} : vector<8x96xf32> to vector<8x32xf32>
    %70 = vector.broadcast %8 : vector<1x32xf32> to vector<8x32xf32>
    %71 = arith.addf %69, %70 : vector<8x32xf32>
    %72 = arith.mulf %59, %71 : vector<8x32xf32>
    %73 = arith.addf %68, %72 : vector<8x32xf32>
    %74 = math.tanh %73 : vector<8x32xf32>
    %75 = arith.subf %46, %74 : vector<8x32xf32>
    %76 = arith.mulf %67, %75 : vector<8x32xf32>
    %77 = arith.addf %74, %76 : vector<8x32xf32>
    %78 = vector.broadcast %c1_i32 : i32 to vector<8x32xi32>
    %79 = arith.cmpi slt, %78, %11 : vector<8x32xi32>
    %80 = arith.select %79, %77, %46 : vector<8x32xi1>, vector<8x32xf32>
    %c2_i32 = arith.constant 2 : i32
    %c8_i32_23 = arith.constant 8 : i32
    %81 = arith.muli %c2_i32, %c8_i32_23 : i32
    %82 = tpu.assume_multiple %81, 8 : i32
    %83 = arith.index_cast %82 : i32 to index
    %c0_24 = arith.constant 0 : index
    %84 = vector.load %arg14[%83, %c0_24] : memref<64x96xf32, #tpu.memory_space<vmem>>, vector<8x96xf32>
    %cst_25 = arith.constant dense<0.000000e+00> : vector<8x96xf32>
    %85 = tpu.matmul %80, %7, %cst_25 {dimension_numbers = #tpu.dot_dimension_numbers<[1], [0], [0], [1], [0, 0, 1, 1], [], []>} : vector<8x32xf32>, vector<32x96xf32>, vector<8x96xf32> -> vector<8x96xf32>
    %86 = vector.extract_strided_slice %84 {offsets = [0, 0], sizes = [8, 32], strides = [1, 1]} : vector<8x96xf32> to vector<8x32xf32>
    %87 = vector.extract_strided_slice %85 {offsets = [0, 0], sizes = [8, 32], strides = [1, 1]} : vector<8x96xf32> to vector<8x32xf32>
    %88 = arith.addf %86, %87 : vector<8x32xf32>
    %89 = arith.negf %88 : vector<8x32xf32>
    %90 = math.exp %89 : vector<8x32xf32>
    %cst_26 = arith.constant 1.000000e+00 : f32
    %91 = vector.broadcast %cst_26 : f32 to vector<8x32xf32>
    %92 = arith.addf %91, %90 : vector<8x32xf32>
    %93 = arith.divf %91, %92 : vector<8x32xf32>
    %94 = vector.extract_strided_slice %84 {offsets = [0, 32], sizes = [8, 32], strides = [1, 1]} : vector<8x96xf32> to vector<8x32xf32>
    %95 = vector.extract_strided_slice %85 {offsets = [0, 32], sizes = [8, 32], strides = [1, 1]} : vector<8x96xf32> to vector<8x32xf32>
    %96 = arith.addf %94, %95 : vector<8x32xf32>
    %97 = arith.negf %96 : vector<8x32xf32>
    %98 = math.exp %97 : vector<8x32xf32>
    %cst_27 = arith.constant 1.000000e+00 : f32
    %99 = vector.broadcast %cst_27 : f32 to vector<8x32xf32>
    %100 = arith.addf %99, %98 : vector<8x32xf32>
    %101 = arith.divf %99, %100 : vector<8x32xf32>
    %102 = vector.extract_strided_slice %84 {offsets = [0, 64], sizes = [8, 32], strides = [1, 1]} : vector<8x96xf32> to vector<8x32xf32>
    %103 = vector.extract_strided_slice %85 {offsets = [0, 64], sizes = [8, 32], strides = [1, 1]} : vector<8x96xf32> to vector<8x32xf32>
    %104 = vector.broadcast %8 : vector<1x32xf32> to vector<8x32xf32>
    %105 = arith.addf %103, %104 : vector<8x32xf32>
    %106 = arith.mulf %93, %105 : vector<8x32xf32>
    %107 = arith.addf %102, %106 : vector<8x32xf32>
    %108 = math.tanh %107 : vector<8x32xf32>
    %109 = arith.subf %80, %108 : vector<8x32xf32>
    %110 = arith.mulf %101, %109 : vector<8x32xf32>
    %111 = arith.addf %108, %110 : vector<8x32xf32>
    %112 = vector.broadcast %c2_i32 : i32 to vector<8x32xi32>
    %113 = arith.cmpi slt, %112, %11 : vector<8x32xi32>
    %114 = arith.select %113, %111, %80 : vector<8x32xi1>, vector<8x32xf32>
    %c3_i32 = arith.constant 3 : i32
    %c8_i32_28 = arith.constant 8 : i32
    %115 = arith.muli %c3_i32, %c8_i32_28 : i32
    %116 = tpu.assume_multiple %115, 8 : i32
    %117 = arith.index_cast %116 : i32 to index
    %c0_29 = arith.constant 0 : index
    %118 = vector.load %arg14[%117, %c0_29] : memref<64x96xf32, #tpu.memory_space<vmem>>, vector<8x96xf32>
    %cst_30 = arith.constant dense<0.000000e+00> : vector<8x96xf32>
    %119 = tpu.matmul %114, %7, %cst_30 {dimension_numbers = #tpu.dot_dimension_numbers<[1], [0], [0], [1], [0, 0, 1, 1], [], []>} : vector<8x32xf32>, vector<32x96xf32>, vector<8x96xf32> -> vector<8x96xf32>
    %120 = vector.extract_strided_slice %118 {offsets = [0, 0], sizes = [8, 32], strides = [1, 1]} : vector<8x96xf32> to vector<8x32xf32>
    %121 = vector.extract_strided_slice %119 {offsets = [0, 0], sizes = [8, 32], strides = [1, 1]} : vector<8x96xf32> to vector<8x32xf32>
    %122 = arith.addf %120, %121 : vector<8x32xf32>
    %123 = arith.negf %122 : vector<8x32xf32>
    %124 = math.exp %123 : vector<8x32xf32>
    %cst_31 = arith.constant 1.000000e+00 : f32
    %125 = vector.broadcast %cst_31 : f32 to vector<8x32xf32>
    %126 = arith.addf %125, %124 : vector<8x32xf32>
    %127 = arith.divf %125, %126 : vector<8x32xf32>
    %128 = vector.extract_strided_slice %118 {offsets = [0, 32], sizes = [8, 32], strides = [1, 1]} : vector<8x96xf32> to vector<8x32xf32>
    %129 = vector.extract_strided_slice %119 {offsets = [0, 32], sizes = [8, 32], strides = [1, 1]} : vector<8x96xf32> to vector<8x32xf32>
    %130 = arith.addf %128, %129 : vector<8x32xf32>
    %131 = arith.negf %130 : vector<8x32xf32>
    %132 = math.exp %131 : vector<8x32xf32>
    %cst_32 = arith.constant 1.000000e+00 : f32
    %133 = vector.broadcast %cst_32 : f32 to vector<8x32xf32>
    %134 = arith.addf %133, %132 : vector<8x32xf32>
    %135 = arith.divf %133, %134 : vector<8x32xf32>
    %136 = vector.extract_strided_slice %118 {offsets = [0, 64], sizes = [8, 32], strides = [1, 1]} : vector<8x96xf32> to vector<8x32xf32>
    %137 = vector.extract_strided_slice %119 {offsets = [0, 64], sizes = [8, 32], strides = [1, 1]} : vector<8x96xf32> to vector<8x32xf32>
    %138 = vector.broadcast %8 : vector<1x32xf32> to vector<8x32xf32>
    %139 = arith.addf %137, %138 : vector<8x32xf32>
    %140 = arith.mulf %127, %139 : vector<8x32xf32>
    %141 = arith.addf %136, %140 : vector<8x32xf32>
    %142 = math.tanh %141 : vector<8x32xf32>
    %143 = arith.subf %114, %142 : vector<8x32xf32>
    %144 = arith.mulf %135, %143 : vector<8x32xf32>
    %145 = arith.addf %142, %144 : vector<8x32xf32>
    %146 = vector.broadcast %c3_i32 : i32 to vector<8x32xi32>
    %147 = arith.cmpi slt, %146, %11 : vector<8x32xi32>
    %148 = arith.select %147, %145, %114 : vector<8x32xi1>, vector<8x32xf32>
    %c4_i32 = arith.constant 4 : i32
    %c8_i32_33 = arith.constant 8 : i32
    %149 = arith.muli %c4_i32, %c8_i32_33 : i32
    %150 = tpu.assume_multiple %149, 8 : i32
    %151 = arith.index_cast %150 : i32 to index
    %c0_34 = arith.constant 0 : index
    %152 = vector.load %arg14[%151, %c0_34] : memref<64x96xf32, #tpu.memory_space<vmem>>, vector<8x96xf32>
    %cst_35 = arith.constant dense<0.000000e+00> : vector<8x96xf32>
    %153 = tpu.matmul %148, %7, %cst_35 {dimension_numbers = #tpu.dot_dimension_numbers<[1], [0], [0], [1], [0, 0, 1, 1], [], []>} : vector<8x32xf32>, vector<32x96xf32>, vector<8x96xf32> -> vector<8x96xf32>
    %154 = vector.extract_strided_slice %152 {offsets = [0, 0], sizes = [8, 32], strides = [1, 1]} : vector<8x96xf32> to vector<8x32xf32>
    %155 = vector.extract_strided_slice %153 {offsets = [0, 0], sizes = [8, 32], strides = [1, 1]} : vector<8x96xf32> to vector<8x32xf32>
    %156 = arith.addf %154, %155 : vector<8x32xf32>
    %157 = arith.negf %156 : vector<8x32xf32>
    %158 = math.exp %157 : vector<8x32xf32>
    %cst_36 = arith.constant 1.000000e+00 : f32
    %159 = vector.broadcast %cst_36 : f32 to vector<8x32xf32>
    %160 = arith.addf %159, %158 : vector<8x32xf32>
    %161 = arith.divf %159, %160 : vector<8x32xf32>
    %162 = vector.extract_strided_slice %152 {offsets = [0, 32], sizes = [8, 32], strides = [1, 1]} : vector<8x96xf32> to vector<8x32xf32>
    %163 = vector.extract_strided_slice %153 {offsets = [0, 32], sizes = [8, 32], strides = [1, 1]} : vector<8x96xf32> to vector<8x32xf32>
    %164 = arith.addf %162, %163 : vector<8x32xf32>
    %165 = arith.negf %164 : vector<8x32xf32>
    %166 = math.exp %165 : vector<8x32xf32>
    %cst_37 = arith.constant 1.000000e+00 : f32
    %167 = vector.broadcast %cst_37 : f32 to vector<8x32xf32>
    %168 = arith.addf %167, %166 : vector<8x32xf32>
    %169 = arith.divf %167, %168 : vector<8x32xf32>
    %170 = vector.extract_strided_slice %152 {offsets = [0, 64], sizes = [8, 32], strides = [1, 1]} : vector<8x96xf32> to vector<8x32xf32>
    %171 = vector.extract_strided_slice %153 {offsets = [0, 64], sizes = [8, 32], strides = [1, 1]} : vector<8x96xf32> to vector<8x32xf32>
    %172 = vector.broadcast %8 : vector<1x32xf32> to vector<8x32xf32>
    %173 = arith.addf %171, %172 : vector<8x32xf32>
    %174 = arith.mulf %161, %173 : vector<8x32xf32>
    %175 = arith.addf %170, %174 : vector<8x32xf32>
    %176 = math.tanh %175 : vector<8x32xf32>
    %177 = arith.subf %148, %176 : vector<8x32xf32>
    %178 = arith.mulf %169, %177 : vector<8x32xf32>
    %179 = arith.addf %176, %178 : vector<8x32xf32>
    %180 = vector.broadcast %c4_i32 : i32 to vector<8x32xi32>
    %181 = arith.cmpi slt, %180, %11 : vector<8x32xi32>
    %182 = arith.select %181, %179, %148 : vector<8x32xi1>, vector<8x32xf32>
    %c5_i32 = arith.constant 5 : i32
    %c8_i32_38 = arith.constant 8 : i32
    %183 = arith.muli %c5_i32, %c8_i32_38 : i32
    %184 = tpu.assume_multiple %183, 8 : i32
    %185 = arith.index_cast %184 : i32 to index
    %c0_39 = arith.constant 0 : index
    %186 = vector.load %arg14[%185, %c0_39] : memref<64x96xf32, #tpu.memory_space<vmem>>, vector<8x96xf32>
    %cst_40 = arith.constant dense<0.000000e+00> : vector<8x96xf32>
    %187 = tpu.matmul %182, %7, %cst_40 {dimension_numbers = #tpu.dot_dimension_numbers<[1], [0], [0], [1], [0, 0, 1, 1], [], []>} : vector<8x32xf32>, vector<32x96xf32>, vector<8x96xf32> -> vector<8x96xf32>
    %188 = vector.extract_strided_slice %186 {offsets = [0, 0], sizes = [8, 32], strides = [1, 1]} : vector<8x96xf32> to vector<8x32xf32>
    %189 = vector.extract_strided_slice %187 {offsets = [0, 0], sizes = [8, 32], strides = [1, 1]} : vector<8x96xf32> to vector<8x32xf32>
    %190 = arith.addf %188, %189 : vector<8x32xf32>
    %191 = arith.negf %190 : vector<8x32xf32>
    %192 = math.exp %191 : vector<8x32xf32>
    %cst_41 = arith.constant 1.000000e+00 : f32
    %193 = vector.broadcast %cst_41 : f32 to vector<8x32xf32>
    %194 = arith.addf %193, %192 : vector<8x32xf32>
    %195 = arith.divf %193, %194 : vector<8x32xf32>
    %196 = vector.extract_strided_slice %186 {offsets = [0, 32], sizes = [8, 32], strides = [1, 1]} : vector<8x96xf32> to vector<8x32xf32>
    %197 = vector.extract_strided_slice %187 {offsets = [0, 32], sizes = [8, 32], strides = [1, 1]} : vector<8x96xf32> to vector<8x32xf32>
    %198 = arith.addf %196, %197 : vector<8x32xf32>
    %199 = arith.negf %198 : vector<8x32xf32>
    %200 = math.exp %199 : vector<8x32xf32>
    %cst_42 = arith.constant 1.000000e+00 : f32
    %201 = vector.broadcast %cst_42 : f32 to vector<8x32xf32>
    %202 = arith.addf %201, %200 : vector<8x32xf32>
    %203 = arith.divf %201, %202 : vector<8x32xf32>
    %204 = vector.extract_strided_slice %186 {offsets = [0, 64], sizes = [8, 32], strides = [1, 1]} : vector<8x96xf32> to vector<8x32xf32>
    %205 = vector.extract_strided_slice %187 {offsets = [0, 64], sizes = [8, 32], strides = [1, 1]} : vector<8x96xf32> to vector<8x32xf32>
    %206 = vector.broadcast %8 : vector<1x32xf32> to vector<8x32xf32>
    %207 = arith.addf %205, %206 : vector<8x32xf32>
    %208 = arith.mulf %195, %207 : vector<8x32xf32>
    %209 = arith.addf %204, %208 : vector<8x32xf32>
    %210 = math.tanh %209 : vector<8x32xf32>
    %211 = arith.subf %182, %210 : vector<8x32xf32>
    %212 = arith.mulf %203, %211 : vector<8x32xf32>
    %213 = arith.addf %210, %212 : vector<8x32xf32>
    %214 = vector.broadcast %c5_i32 : i32 to vector<8x32xi32>
    %215 = arith.cmpi slt, %214, %11 : vector<8x32xi32>
    %216 = arith.select %215, %213, %182 : vector<8x32xi1>, vector<8x32xf32>
    %c6_i32 = arith.constant 6 : i32
    %c8_i32_43 = arith.constant 8 : i32
    %217 = arith.muli %c6_i32, %c8_i32_43 : i32
    %218 = tpu.assume_multiple %217, 8 : i32
    %219 = arith.index_cast %218 : i32 to index
    %c0_44 = arith.constant 0 : index
    %220 = vector.load %arg14[%219, %c0_44] : memref<64x96xf32, #tpu.memory_space<vmem>>, vector<8x96xf32>
    %cst_45 = arith.constant dense<0.000000e+00> : vector<8x96xf32>
    %221 = tpu.matmul %216, %7, %cst_45 {dimension_numbers = #tpu.dot_dimension_numbers<[1], [0], [0], [1], [0, 0, 1, 1], [], []>} : vector<8x32xf32>, vector<32x96xf32>, vector<8x96xf32> -> vector<8x96xf32>
    %222 = vector.extract_strided_slice %220 {offsets = [0, 0], sizes = [8, 32], strides = [1, 1]} : vector<8x96xf32> to vector<8x32xf32>
    %223 = vector.extract_strided_slice %221 {offsets = [0, 0], sizes = [8, 32], strides = [1, 1]} : vector<8x96xf32> to vector<8x32xf32>
    %224 = arith.addf %222, %223 : vector<8x32xf32>
    %225 = arith.negf %224 : vector<8x32xf32>
    %226 = math.exp %225 : vector<8x32xf32>
    %cst_46 = arith.constant 1.000000e+00 : f32
    %227 = vector.broadcast %cst_46 : f32 to vector<8x32xf32>
    %228 = arith.addf %227, %226 : vector<8x32xf32>
    %229 = arith.divf %227, %228 : vector<8x32xf32>
    %230 = vector.extract_strided_slice %220 {offsets = [0, 32], sizes = [8, 32], strides = [1, 1]} : vector<8x96xf32> to vector<8x32xf32>
    %231 = vector.extract_strided_slice %221 {offsets = [0, 32], sizes = [8, 32], strides = [1, 1]} : vector<8x96xf32> to vector<8x32xf32>
    %232 = arith.addf %230, %231 : vector<8x32xf32>
    %233 = arith.negf %232 : vector<8x32xf32>
    %234 = math.exp %233 : vector<8x32xf32>
    %cst_47 = arith.constant 1.000000e+00 : f32
    %235 = vector.broadcast %cst_47 : f32 to vector<8x32xf32>
    %236 = arith.addf %235, %234 : vector<8x32xf32>
    %237 = arith.divf %235, %236 : vector<8x32xf32>
    %238 = vector.extract_strided_slice %220 {offsets = [0, 64], sizes = [8, 32], strides = [1, 1]} : vector<8x96xf32> to vector<8x32xf32>
    %239 = vector.extract_strided_slice %221 {offsets = [0, 64], sizes = [8, 32], strides = [1, 1]} : vector<8x96xf32> to vector<8x32xf32>
    %240 = vector.broadcast %8 : vector<1x32xf32> to vector<8x32xf32>
    %241 = arith.addf %239, %240 : vector<8x32xf32>
    %242 = arith.mulf %229, %241 : vector<8x32xf32>
    %243 = arith.addf %238, %242 : vector<8x32xf32>
    %244 = math.tanh %243 : vector<8x32xf32>
    %245 = arith.subf %216, %244 : vector<8x32xf32>
    %246 = arith.mulf %237, %245 : vector<8x32xf32>
    %247 = arith.addf %244, %246 : vector<8x32xf32>
    %248 = vector.broadcast %c6_i32 : i32 to vector<8x32xi32>
    %249 = arith.cmpi slt, %248, %11 : vector<8x32xi32>
    %250 = arith.select %249, %247, %216 : vector<8x32xi1>, vector<8x32xf32>
    %c7_i32 = arith.constant 7 : i32
    %c8_i32_48 = arith.constant 8 : i32
    %251 = arith.muli %c7_i32, %c8_i32_48 : i32
    %252 = tpu.assume_multiple %251, 8 : i32
    %253 = arith.index_cast %252 : i32 to index
    %c0_49 = arith.constant 0 : index
    %254 = vector.load %arg14[%253, %c0_49] : memref<64x96xf32, #tpu.memory_space<vmem>>, vector<8x96xf32>
    %cst_50 = arith.constant dense<0.000000e+00> : vector<8x96xf32>
    %255 = tpu.matmul %250, %7, %cst_50 {dimension_numbers = #tpu.dot_dimension_numbers<[1], [0], [0], [1], [0, 0, 1, 1], [], []>} : vector<8x32xf32>, vector<32x96xf32>, vector<8x96xf32> -> vector<8x96xf32>
    %256 = vector.extract_strided_slice %254 {offsets = [0, 0], sizes = [8, 32], strides = [1, 1]} : vector<8x96xf32> to vector<8x32xf32>
    %257 = vector.extract_strided_slice %255 {offsets = [0, 0], sizes = [8, 32], strides = [1, 1]} : vector<8x96xf32> to vector<8x32xf32>
    %258 = arith.addf %256, %257 : vector<8x32xf32>
    %259 = arith.negf %258 : vector<8x32xf32>
    %260 = math.exp %259 : vector<8x32xf32>
    %cst_51 = arith.constant 1.000000e+00 : f32
    %261 = vector.broadcast %cst_51 : f32 to vector<8x32xf32>
    %262 = arith.addf %261, %260 : vector<8x32xf32>
    %263 = arith.divf %261, %262 : vector<8x32xf32>
    %264 = vector.extract_strided_slice %254 {offsets = [0, 32], sizes = [8, 32], strides = [1, 1]} : vector<8x96xf32> to vector<8x32xf32>
    %265 = vector.extract_strided_slice %255 {offsets = [0, 32], sizes = [8, 32], strides = [1, 1]} : vector<8x96xf32> to vector<8x32xf32>
    %266 = arith.addf %264, %265 : vector<8x32xf32>
    %267 = arith.negf %266 : vector<8x32xf32>
    %268 = math.exp %267 : vector<8x32xf32>
    %cst_52 = arith.constant 1.000000e+00 : f32
    %269 = vector.broadcast %cst_52 : f32 to vector<8x32xf32>
    %270 = arith.addf %269, %268 : vector<8x32xf32>
    %271 = arith.divf %269, %270 : vector<8x32xf32>
    %272 = vector.extract_strided_slice %254 {offsets = [0, 64], sizes = [8, 32], strides = [1, 1]} : vector<8x96xf32> to vector<8x32xf32>
    %273 = vector.extract_strided_slice %255 {offsets = [0, 64], sizes = [8, 32], strides = [1, 1]} : vector<8x96xf32> to vector<8x32xf32>
    %274 = vector.broadcast %8 : vector<1x32xf32> to vector<8x32xf32>
    %275 = arith.addf %273, %274 : vector<8x32xf32>
    %276 = arith.mulf %263, %275 : vector<8x32xf32>
    %277 = arith.addf %272, %276 : vector<8x32xf32>
    %278 = math.tanh %277 : vector<8x32xf32>
    %279 = arith.subf %250, %278 : vector<8x32xf32>
    %280 = arith.mulf %271, %279 : vector<8x32xf32>
    %281 = arith.addf %278, %280 : vector<8x32xf32>
    %282 = vector.broadcast %c7_i32 : i32 to vector<8x32xi32>
    %283 = arith.cmpi slt, %282, %11 : vector<8x32xi32>
    %284 = arith.select %283, %281, %250 : vector<8x32xi1>, vector<8x32xf32>
    %c8_i32_53 = arith.constant 8 : i32
    %c0_54 = arith.constant 0 : index
    %c0_55 = arith.constant 0 : index
    %285 = vector.load %arg7[%c0_54, %c0_55] : memref<32x256xf32, #tpu.memory_space<vmem>>, vector<32x256xf32>
    %cst_56 = arith.constant dense<0.000000e+00> : vector<8x256xf32>
    %286 = tpu.matmul %284, %285, %cst_56 {dimension_numbers = #tpu.dot_dimension_numbers<[1], [0], [0], [1], [0, 0, 1, 1], [], []>} : vector<8x32xf32>, vector<32x256xf32>, vector<8x256xf32> -> vector<8x256xf32>
    %c0_57 = arith.constant 0 : index
    %c0_58 = arith.constant 0 : index
    %287 = vector.load %arg8[%c0_57, %c0_58] : memref<1x256xf32, #tpu.memory_space<vmem>>, vector<1x256xf32>
    %288 = vector.broadcast %287 : vector<1x256xf32> to vector<8x256xf32>
    %289 = arith.addf %286, %288 : vector<8x256xf32>
    %cst_59 = arith.constant 0.000000e+00 : f32
    %290 = vector.broadcast %cst_59 : f32 to vector<8x256xf32>
    %291 = arith.cmpf ogt, %289, %290 : vector<8x256xf32>
    %cst_60 = arith.constant 0.00999999977 : f32
    %292 = vector.broadcast %cst_60 : f32 to vector<8x256xf32>
    %293 = arith.mulf %292, %289 : vector<8x256xf32>
    %294 = arith.select %291, %289, %293 : vector<8x256xi1>, vector<8x256xf32>
    %c0_61 = arith.constant 0 : index
    %c0_62 = arith.constant 0 : index
    %295 = vector.load %arg9[%c0_61, %c0_62] : memref<256x64xf32, #tpu.memory_space<vmem>>, vector<256x64xf32>
    %cst_63 = arith.constant dense<0.000000e+00> : vector<8x64xf32>
    %296 = tpu.matmul %294, %295, %cst_63 {dimension_numbers = #tpu.dot_dimension_numbers<[1], [0], [0], [1], [0, 0, 1, 1], [], []>} : vector<8x256xf32>, vector<256x64xf32>, vector<8x64xf32> -> vector<8x64xf32>
    %c0_64 = arith.constant 0 : index
    %c0_65 = arith.constant 0 : index
    %297 = vector.load %arg10[%c0_64, %c0_65] : memref<1x64xf32, #tpu.memory_space<vmem>>, vector<1x64xf32>
    %298 = vector.broadcast %297 : vector<1x64xf32> to vector<8x64xf32>
    %299 = arith.addf %296, %298 : vector<8x64xf32>
    %cst_66 = arith.constant 0.000000e+00 : f32
    %300 = vector.broadcast %cst_66 : f32 to vector<8x64xf32>
    %301 = arith.cmpf ogt, %299, %300 : vector<8x64xf32>
    %cst_67 = arith.constant 0.00999999977 : f32
    %302 = vector.broadcast %cst_67 : f32 to vector<8x64xf32>
    %303 = arith.mulf %302, %299 : vector<8x64xf32>
    %304 = arith.select %301, %299, %303 : vector<8x64xi1>, vector<8x64xf32>
    %c0_68 = arith.constant 0 : index
    %c0_69 = arith.constant 0 : index
    %305 = vector.load %arg11[%c0_68, %c0_69] : memref<64x2xf32, #tpu.memory_space<vmem>>, vector<64x2xf32>
    %cst_70 = arith.constant dense<0.000000e+00> : vector<8x2xf32>
    %306 = tpu.matmul %304, %305, %cst_70 {dimension_numbers = #tpu.dot_dimension_numbers<[1], [0], [0], [1], [0, 0, 1, 1], [], []>} : vector<8x64xf32>, vector<64x2xf32>, vector<8x2xf32> -> vector<8x2xf32>
    %c0_71 = arith.constant 0 : index
    %c0_72 = arith.constant 0 : index
    %307 = vector.load %arg12[%c0_71, %c0_72] : memref<1x2xf32, #tpu.memory_space<vmem>>, vector<1x2xf32>
    %308 = vector.broadcast %307 : vector<1x2xf32> to vector<8x2xf32>
    %309 = arith.addf %306, %308 : vector<8x2xf32>
    %c0_73 = arith.constant 0 : index
    %c0_74 = arith.constant 0 : index
    %310 = vector.load %arg13[%c0_73, %c0_74] : memref<8x2xf32, #tpu.memory_space<vmem>>, vector<8x2xf32>
    tpu.vector_store %arg13[%c0_73, %c0_74], %309 {strides = array<i32>} : memref<8x2xf32, #tpu.memory_space<vmem>>, vector<8x2xf32>,
    return
  }
  func.func @transform_0(%arg0: i32) -> (i32, i32) {
    %c0_i32 = arith.constant 0 : i32
    %c0_i32_0 = arith.constant 0 : i32
    %c0_i32_1 = arith.constant 0 : i32
    return %c0_i32, %c0_i32_0 : i32, i32
  }
  func.func @transform_1(%arg0: i32) -> (i32, i32) {
    %c0_i32 = arith.constant 0 : i32
    %c0_i32_0 = arith.constant 0 : i32
    %c0_i32_1 = arith.constant 0 : i32
    return %c0_i32, %c0_i32_0 : i32, i32
  }
  func.func @transform_2(%arg0: i32) -> (i32, i32) {
    %c0_i32 = arith.constant 0 : i32
    %c0_i32_0 = arith.constant 0 : i32
    %c0_i32_1 = arith.constant 0 : i32
    return %c0_i32, %c0_i32_0 : i32, i32
  }
  func.func @transform_3(%arg0: i32) -> (i32, i32) {
    %c0_i32 = arith.constant 0 : i32
    %c0_i32_0 = arith.constant 0 : i32
    %c0_i32_1 = arith.constant 0 : i32
    return %c0_i32, %c0_i32_0 : i32, i32
  }
  func.func @transform_4(%arg0: i32) -> (i32, i32) {
    %c0_i32 = arith.constant 0 : i32
    %c0_i32_0 = arith.constant 0 : i32
    %c0_i32_1 = arith.constant 0 : i32
    return %c0_i32, %c0_i32_0 : i32, i32
  }
  func.func @transform_5(%arg0: i32) -> (i32, i32) {
    %c0_i32 = arith.constant 0 : i32
    %c0_i32_0 = arith.constant 0 : i32
    %c0_i32_1 = arith.constant 0 : i32
    return %c0_i32, %c0_i32_0 : i32, i32
  }
  func.func @transform_6(%arg0: i32) -> (i32, i32) {
    %c0_i32 = arith.constant 0 : i32
    %c0_i32_0 = arith.constant 0 : i32
    %c0_i32_1 = arith.constant 0 : i32
    return %c0_i32, %c0_i32_0 : i32, i32
  }
  func.func @transform_7(%arg0: i32) -> (i32, i32) {
    %c0_i32 = arith.constant 0 : i32
    %c0_i32_0 = arith.constant 0 : i32
    %c0_i32_1 = arith.constant 0 : i32
    return %c0_i32, %c0_i32_0 : i32, i32
  }
  func.func @transform_8(%arg0: i32) -> (i32, i32) {
    %c0_i32 = arith.constant 0 : i32
    %c0_i32_0 = arith.constant 0 : i32
    %c0_i32_1 = arith.constant 0 : i32
    return %c0_i32, %c0_i32_0 : i32, i32
  }
  func.func @transform_9(%arg0: i32) -> (i32, i32) {
    %c0_i32 = arith.constant 0 : i32
    %c0_i32_0 = arith.constant 0 : i32
    %c0_i32_1 = arith.constant 0 : i32
    return %c0_i32, %c0_i32_0 : i32, i32
  }
  func.func @transform_10(%arg0: i32) -> (i32, i32) {
    %c0_i32 = arith.constant 0 : i32
    %c0_i32_0 = arith.constant 0 : i32
    %c0_i32_1 = arith.constant 0 : i32
    return %c0_i32, %c0_i32_0 : i32, i32
  }
  func.func @transform_11(%arg0: i32) -> (i32, i32) {
    %c0_i32 = arith.constant 0 : i32
    %c0_i32_0 = arith.constant 0 : i32
    %c0_i32_1 = arith.constant 0 : i32
    return %c0_i32, %c0_i32_0 : i32, i32
  }
  func.func @transform_12(%arg0: i32) -> (i32, i32) {
    %c0_i32 = arith.constant 0 : i32
    %c0_i32_0 = arith.constant 0 : i32
    %c0_i32_1 = arith.constant 0 : i32
    return %c0_i32, %c0_i32_0 : i32, i32
  }
}

</mosaic_0001>

<bundles_post_ra>
// kernel: tpu_custom_call.1
= control target key start
LH: loop header
LB: loop body
LE: loop exit
PB: predicated region body
PF: predicated region fallthrough
CT: control target
= control target key end

     0   :  { %v1701_v0 = vmov 0.0   ;;  %vm1702_vm0 = vmmov 0   ;;  %vm60_vm1 = vcmask 261120   ;;  %s1703_s23 = smov 64   ;;  %vm190_vm2 = vcmask 785408   ;;  %s1705_s26 = smov 96   ;;  %s2185_s2 = inlined_call_operand.vmem [shape: f32[32,96], index: 2, kind: input, shape index: {}]   ;;  %s2186_s3 = inlined_call_operand.vmem [shape: f32[32,96], index: 3, kind: input, shape index: {}]   ;;  %s2187_s0 = inlined_call_operand.vmem [shape: f32[64,32], index: 0, kind: input, shape index: {}]   ;;  %s2188_s5 = inlined_call_operand.vmem [shape: f32[1,32], index: 5, kind: input, shape index: {}]   ;;  %s2189_s4 = inlined_call_operand.vmem [shape: f32[1,96], index: 4, kind: input, shape index: {}]   ;;  %s2190_s1 = inlined_call_operand.vmem [shape: s32[8,1], index: 1, kind: input, shape index: {}]   ;;  %s2191_s6 = inlined_call_operand.vmem [shape: f32[32,256], index: 6, kind: input, shape index: {}]   ;;  %s2192_s8 = inlined_call_operand.vmem [shape: f32[256,64], index: 8, kind: input, shape index: {}]   ;;  %s2193_s10 = inlined_call_operand.vmem [shape: f32[64,2], index: 10, kind: input, shape index: {}]   ;;  %s2194_s7 = inlined_call_operand.vmem [shape: f32[1,256], index: 7, kind: input, shape index: {}]   ;;  %s2195_s9 = inlined_call_operand.vmem [shape: f32[1,64], index: 9, kind: input, shape index: {}]   ;;  %s2196_s11 = inlined_call_operand.vmem [shape: f32[1,2], index: 11, kind: input, shape index: {}]   ;;  %s2197_s12 = inlined_call_operand.vmem [shape: f32[8,2], index: 12, kind: output, shape index: {}]  }
   0x1   :  { %1539 = vmatprep.subr.mxu1 %v1701_v0  ;;  %v52_v1 = vld [vmem:[%s2185_s2 + $0x18] sm:$0xff]  ;;  %v51_v3 = vld [vmem:[%s2185_s2 + $0x10] sm:$0xff]  ;;  %1547 = vmatprep.mubr.msk.f32.mxu1 %vm1702_vm0, %v1701_v0  ;;  %v50_v5 = vld [vmem:[%s2185_s2 + $0x8] sm:$0xff]  ;;  %v1704_v29 = vmov 0   ;;  %s1706_s27 = smov 32   ;;  %vm1314_vm14 = vcmask 523264  }
   0x2   :  { %v1779_v2 = vld [vmem:[%s2186_s3 + $0x18] sm:$0xff]  ;;  %1519 = vmatprep.subr.mxu0 %v52_v1  ;;  %v1790_v4 = vld [vmem:[%s2186_s3 + $0x10] sm:$0xff]  ;;  %v1799_v6 = vld [vmem:[%s2186_s3 + $0x8] sm:$0xff]  ;;  %1652 = vset.pattern.permute.xlu0 %v1704_v29  ;;  %vm1388_vm15 = vcmask 15360  }
   0x3   :  { %1540 = vmatpush3.msra.mxu1 %v1779_v2  ;;  %1520 = vmatpush3.msra.mxu0 %v52_v1  ;;  %v49_v7 = vld [vmem:[%s2185_s2] sm:$0xff]  ;;  %v42_v10 = vld [vmem:[%s2187_s0 + $0x8] sm:$0xff]  ;;  %v43_v57 = vld [vmem:[%s2187_s0 + $0x10] sm:$0xff] }
   0x4   :  { %1541 = vmatprep.subr.mxu1 %v1701_v0  ;;  %1521 = vmatprep.subr.mxu0 %v51_v3  ;;  %v1809_v8 = vld [vmem:[%s2186_s3] sm:$0xff]  ;;  %v44_v58 = vld [vmem:[%s2187_s0 + $0x18] sm:$0xff]  ;;  %v46_v60 = vld [vmem:[%s2187_s0 + $0x28] sm:$0xff] }
   0x5   :  { %1542 = vmatpush3.msra.mxu1 %v1790_v4  ;;  %1522 = vmatpush3.msra.mxu0 %v51_v3  ;;  %v41_v9 = vld [vmem:[%s2187_s0] sm:$0xff]  ;;  %v47_v61 = vld [vmem:[%s2187_s0 + $0x30] sm:$0xff]  ;;  %v48_v63 = vld [vmem:[%s2187_s0 + $0x38] sm:$0xff] }
   0x6   :  { %1543 = vmatprep.subr.mxu1 %v1701_v0  ;;  %1523 = vmatprep.subr.mxu0 %v50_v5  ;;  %v1404_v11 = vld [vmem:[%s2188_s5] ss:$0 sm:$0xff] }
   0x7   :  { %1544 = vmatpush3.msra.mxu1 %v1799_v6  ;;  %1524 = vmatpush3.msra.mxu0 %v50_v5  ;;  %v1852_v15 = vld [vmem:[%s2189_s4] ss:$0 sm:$0xff] }
   0x8   :  { %1545 = vmatprep.subr.mxu1 %v1701_v0  ;;  %1525 = vmatprep.subr.mxu0 %v49_v7  ;;  %v204_v30 = vld [vmem:[%s2190_s1] sm:$0xff] }
   0x9   :  { %1546 = vmatpush3.msra.mxu1 %v1809_v8  ;;  %1526 = vmatpush3.msra.mxu0 %v49_v7  ;;  %v45_v59 = vld [vmem:[%s2187_s0 + $0x20] sm:$0xff] }
   0xa   :  { %1527 = vmatprep.mubr.msk.f32.mxu0 %vm60_vm1, %v41_v9  ;;  %1548 = vmatmul.mubr.f32.vlgmr.msra.gmra.mxu1 %v1701_v0 }
   0xb   :  { %1528 = vmatmul.mubr.msk.f32.vlgmr.msra.gmra.mxu0 %vm60_vm1, %v42_v10  ;;  %294 = vrot.lane.b32.xlu0 %v1404_v11, %s1703_s23 }
   0xc   :  { %1550 = vmatprep.subr.mxu1 %v1701_v0  ;;  %1558 = vmatprep.mubr.msk.f32.mxu1 %vm1702_vm0, %v1701_v0 }
   0xd   :  { %1551 = vmatpush3.msra.mxu1 %v1779_v2  ;;  %1561 = vmatprep.subr.mxu0 %v1701_v0 }
   0xe   :  { %1552 = vmatprep.subr.mxu1 %v1701_v0  ;;  %1562 = vmatpush3.msra.mxu0 %v1779_v2 }
   0xf   :  { %1553 = vmatpush3.msra.mxu1 %v1790_v4  ;;  %1563 = vmatprep.subr.mxu0 %v1701_v0 }
  0x10   :  { %1554 = vmatprep.subr.mxu1 %v1701_v0  ;;  %1564 = vmatpush3.msra.mxu0 %v1790_v4 }
  0x11   :  { %1555 = vmatpush3.msra.mxu1 %v1799_v6  ;;  %1565 = vmatprep.subr.mxu0 %v1701_v0 }
  0x12   :  { %1556 = vmatprep.subr.mxu1 %v1701_v0  ;;  %1566 = vmatpush3.msra.mxu0 %v1799_v6 }
  0x13   :  { %1557 = vmatpush3.msra.mxu1 %v1809_v8  ;;  %1567 = vmatprep.subr.mxu0 %v1701_v0 }
  0x14   :  { %1572 = vmatprep.subr.mxu1 %v1701_v0  ;;  %1568 = vmatpush3.msra.mxu0 %v1809_v8 }
  0x15   :  { %1583 = vmatprep.subr.mxu0 %v1701_v0  ;;  %1530 = vmatprep.mubr.msk.f32.mxu0 %vm60_vm1, %v43_v57 }
  0x16   :  { %1531 = vmatmul.mubr.msk.f32.gmra.mxu0 %vm60_vm1, %v44_v58 }
  0x17   :  { %1533 = vmatprep.mubr.msk.f32.mxu0 %vm60_vm1, %v45_v59 }
  0x1a   :  { %1534 = vmatmul.mubr.msk.f32.gmra.mxu0 %vm60_vm1, %v46_v60 }
  0x1b   :  { %1536 = vmatprep.mubr.msk.f32.mxu0 %vm60_vm1, %v47_v61 }
  0x1e   :  { %1537 = vmatmul.mubr.msk.f32.gmra.mxu0 %vm60_vm1, %v48_v63 }
  0x1f   :  { %1569 = vmatprep.mubr.msk.f32.mxu0 %vm1702_vm0, %v1701_v0 }
  0x7d   :  { %v1847_v12 = vpop.permute.xlu0 %294 }
  0xca   :  { %v278_v13 = vpop.f32.mrf.mxu1 }
  0xcb   :  { %v1529_v14 = vpop.f32.mrf.mxu0  ;;  %v297_v16 = vadd.f32 %v1847_v12, %v278_v13 }
  0xcc   :  { %v157_v17 = vadd.f32 %v1529_v14, %v1852_v15  ;;  %v1549_v18 = vpop.f32.mrf.mxu1 }
  0xcd   :  { %v151_v19 = vpop.f32.mrf.mxu0  ;;  %299 = vrot.lane.b32.xlu0 %v297_v16, %s1703_s23 }
  0xce   :  { %192 = vst.msk [vmem:[#allocation2 + $0x8] sm:$0xff] %vm190_vm2, %v157_v17  ;;  %v152_v20 = vadd.f32 %v1852_v15, %v151_v19 }
  0xd0   :  { %191 = vst.msk [vmem:[#allocation2] sm:$0xff] %vm190_vm2, %v152_v20 }
  0xd1   :  { %206 = vperm.xlu0 %1652, %v204_v30  }
  0xd5   :  { %v323_v45 = vld [vmem:[#allocation2 + $0x8] sm:$0xff] }
  0xd6   :  { %v1532_v9 = vpop.f32.mrf.mxu0 }
  0xd7   :  { %v208_v21 = vld [vmem:[#allocation2] sm:$0xff]  ;;  %v167_v10 = vadd.f32 %v1532_v9, %v1852_v15 }
  0xd8   :  { %v282_v22 = vadd.f32 %v278_v13, %v208_v21  ;;  %v161_v11 = vpop.f32.mrf.mxu0 }
  0xd9   :  { %194 = vst.msk [vmem:[#allocation2 + $0x18] sm:$0xff] %vm190_vm2, %v167_v10  ;;  %v162_v13 = vadd.f32 %v1852_v15, %v161_v11 }
  0xda   :  { %v1403_v23 = vmul.f32 -1.442695, %v282_v22  ;;  %v1535_v14 = vpop.f32.mrf.mxu0 }
  0xdb   :  { %193 = vst.msk [vmem:[#allocation2 + $0x10] sm:$0xff] %vm190_vm2, %v162_v13  ;;  %v177_v16 = vadd.f32 %v1535_v14, %v1852_v15 }
  0xdc   :  { %1653 = vpow2.f32 %v1403_v23  ;;  %v171_v17 = vpop.f32.mrf.mxu0 }
  0xdd   :  { %196 = vst.msk [vmem:[#allocation2 + $0x28] sm:$0xff] %vm190_vm2, %v177_v16  ;;  %v172_v18 = vadd.f32 %v1852_v15, %v171_v17 }
  0xde   :  { %v1538_v19 = vpop.f32.mrf.mxu0 }
  0xdf   :  { %195 = vst.msk [vmem:[#allocation2 + $0x20] sm:$0xff] %vm190_vm2, %v172_v18  ;;  %v187_v20 = vadd.f32 %v1538_v19, %v1852_v15 }
  0xe1   :  { %198 = vst.msk [vmem:[#allocation2 + $0x38] sm:$0xff] %vm190_vm2, %v187_v20 }
  0xe6   :  { %v650_v10 = vld [vmem:[#allocation2 + $0x20] sm:$0xff] }
  0xe9   :  { %v1654_v24 = vpop.eup %1653 }
  0xea   :  { %v286_v25 = vadd.f32 1.0, %v1654_v24 }
  0xec   :  { %1655 = vrcp.f32 %v286_v25 }
  0xf9   :  { %v1656_v26 = vpop.eup %1655 }
 0x13f   :  { %v300_v27 = vpop.permute.xlu0 %299 }
 0x140   :  { %v302_v28 = vmul.f32 %v1656_v26, %v300_v27 }
 0x142   :  { %304 = vrot.lane.b32.xlu1 %v302_v28, %s1703_s23 }
 0x14c   :  { %v1866_v37 = vpop.permute.xlu0 %206 }
 0x14d   :  { %vm320_vm3 = vcmp.gt.s32.totalorder %v1866_v37, 0  ;;  %vm429_vm4 = vcmp.gt.s32.totalorder %v1866_v37, 1  ;;  %vm538_vm5 = vcmp.gt.s32.totalorder %v1866_v37, 2  ;;  %vm647_vm6 = vcmp.gt.s32.totalorder %v1866_v37, 3 }
 0x14e   :  { %vm756_vm7 = vcmp.gt.s32.totalorder %v1866_v37, 4  ;;  %vm865_vm8 = vcmp.gt.s32.totalorder %v1866_v37, 5  ;;  %vm974_vm9 = vcmp.gt.s32.totalorder %v1866_v37, 6  ;;  %vm1083_vm10 = vcmp.gt.s32.totalorder %v1866_v37, 7  ;;  %v1195_v37 = vld [vmem:[%s2192_s8 + $0x40] sm:$0xff] }
 0x1b4   :  { %v305_v31 = vpop.permute.xlu1 %304 }
 0x1b5   :  { %v307_v32 = vadd.f32 %v305_v31, %v208_v21  ;;  %v181_v21 = vpop.f32.mrf.mxu0 }
 0x1b6   :  { %v182_v22 = vadd.f32 %v1852_v15, %v181_v21 }
 0x1b7   :  { %1657 = vtanh.f32 %v307_v32 }
 0x1b8   :  { %197 = vst.msk [vmem:[#allocation2 + $0x30] sm:$0xff] %vm190_vm2, %v182_v22 }
 0x1c4   :  { %v1658_v33 = vpop.eup %1657 }
 0x1c5   :  { %v309_v34 = vsub.f32 0.0, %v1658_v33 }
 0x1c7   :  { %311 = vrot.lane.b32.xlu1 %v309_v34, %s1705_s26 }
 0x239   :  { %v312_v35 = vpop.permute.xlu1 %311 }
 0x23a   :  { %v314_v36 = vmul.f32 %v1656_v26, %v312_v35  ;;  %v432_v26 = vld [vmem:[#allocation2 + $0x10] sm:$0xff] }
 0x23c   :  { %316 = vrot.lane.b32.xlu1 %v314_v36, %s1706_s27 }
 0x2ae   :  { %v317_v38 = vpop.permute.xlu1 %316 }
 0x2af   :  { %v319_v39 = vadd.f32 %v1658_v33, %v317_v38 }
 0x2b1   :  { %v321_v40 = vsel %vm320_vm3, %v319_v39, 0.0 }
 0x2b2   :  { %325 = vrot.lane.b32.xlu1 %v321_v40, %s1703_s23 }
 0x324   :  { %v326_v41 = vpop.permute.xlu1 %325 }
 0x325   :  { %1559 = vmatmul.mubr.msk.f32.vlgmr.msra.gmra.mxu1 %vm60_vm1, %v326_v41 }
 0x326   :  { %1573 = vmatpush3.msra.mxu1 %v1779_v2  ;;  %1580 = vmatprep.mubr.msk.f32.mxu1 %vm1702_vm0, %v1701_v0 }
 0x327   :  { %1574 = vmatprep.subr.mxu1 %v1701_v0 }
 0x328   :  { %1575 = vmatpush3.msra.mxu1 %v1790_v4 }
 0x329   :  { %1576 = vmatprep.subr.mxu1 %v1701_v0 }
 0x32a   :  { %1577 = vmatpush3.msra.mxu1 %v1799_v6 }
 0x32b   :  { %1578 = vmatprep.subr.mxu1 %v1701_v0 }
 0x32c   :  { %1579 = vmatpush3.msra.mxu1 %v1809_v8 }
 0x32d   :  { %1594 = vmatprep.subr.mxu1 %v1701_v0 }
 0x3e5   :  { %v395_v42 = vpop.f32.mrf.mxu1 }
 0x3e6   :  { %v406_v43 = vadd.f32 %v395_v42, %v1847_v12  ;;  %v399_v46 = vadd.f32 %v395_v42, %v323_v45 }
 0x3e7   :  { %v1560_v44 = vpop.f32.mrf.mxu1 }
 0x3e8   :  { %408 = vrot.lane.b32.xlu0 %v406_v43, %s1703_s23  ;;  %v1406_v47 = vmul.f32 -1.442695, %v399_v46 }
 0x3ea   :  { %1659 = vpow2.f32 %v1406_v47 }
 0x3f7   :  { %v1660_v48 = vpop.eup %1659 }
 0x3f8   :  { %v403_v49 = vadd.f32 1.0, %v1660_v48  ;;  %v541_v48 = vld [vmem:[#allocation2 + $0x18] sm:$0xff] }
 0x3fa   :  { %1661 = vrcp.f32 %v403_v49 }
 0x407   :  { %v1662_v50 = vpop.eup %1661 }
 0x45a   :  { %v409_v51 = vpop.permute.xlu0 %408 }
 0x45b   :  { %v411_v52 = vmul.f32 %v1662_v50, %v409_v51 }
 0x45d   :  { %413 = vrot.lane.b32.xlu1 %v411_v52, %s1703_s23 }
 0x4cf   :  { %v414_v53 = vpop.permute.xlu1 %413 }
 0x4d0   :  { %v416_v54 = vadd.f32 %v414_v53, %v323_v45 }
 0x4d2   :  { %1663 = vtanh.f32 %v416_v54 }
 0x4df   :  { %v1664_v55 = vpop.eup %1663 }
 0x4e0   :  { %v418_v56 = vsub.f32 %v321_v40, %v1664_v55 }
 0x4e2   :  { %420 = vrot.lane.b32.xlu0 %v418_v56, %s1705_s26 }
 0x554   :  { %v421_v62 = vpop.permute.xlu0 %420 }
 0x555   :  { %v423_v1 = vmul.f32 %v1662_v50, %v421_v62 }
 0x557   :  { %425 = vrot.lane.b32.xlu1 %v423_v1, %s1706_s27 }
 0x5c9   :  { %v426_v3 = vpop.permute.xlu1 %425 }
 0x5ca   :  { %v428_v5 = vadd.f32 %v1664_v55, %v426_v3 }
 0x5cc   :  { %v430_v7 = vsel %vm429_vm4, %v428_v5, %v321_v40 }
 0x5cd   :  { %434 = vrot.lane.b32.xlu0 %v430_v7, %s1703_s23 }
 0x63f   :  { %v435_v23 = vpop.permute.xlu0 %434 }
 0x640   :  { %1570 = vmatmul.mubr.msk.f32.vlgmr.msra.gmra.mxu0 %vm60_vm1, %v435_v23 }
 0x641   :  { %1584 = vmatpush3.msra.mxu0 %v1779_v2  ;;  %1591 = vmatprep.mubr.msk.f32.mxu0 %vm1702_vm0, %v1701_v0 }
 0x642   :  { %1585 = vmatprep.subr.mxu0 %v1701_v0 }
 0x643   :  { %1586 = vmatpush3.msra.mxu0 %v1790_v4 }
 0x644   :  { %1587 = vmatprep.subr.mxu0 %v1701_v0 }
 0x645   :  { %1588 = vmatpush3.msra.mxu0 %v1799_v6 }
 0x646   :  { %1589 = vmatprep.subr.mxu0 %v1701_v0 }
 0x647   :  { %1590 = vmatpush3.msra.mxu0 %v1809_v8 }
 0x648   :  { %1605 = vmatprep.subr.mxu0 %v1701_v0 }
 0x700   :  { %v504_v15 = vpop.f32.mrf.mxu0 }
 0x701   :  { %v515_v24 = vadd.f32 %v504_v15, %v1847_v12  ;;  %v508_v27 = vadd.f32 %v504_v15, %v432_v26 }
 0x702   :  { %v1571_v25 = vpop.f32.mrf.mxu0 }
 0x703   :  { %517 = vrot.lane.b32.xlu1 %v515_v24, %s1703_s23  ;;  %v1408_v28 = vmul.f32 -1.442695, %v508_v27 }
 0x705   :  { %1665 = vpow2.f32 %v1408_v28 }
 0x712   :  { %v1666_v29 = vpop.eup %1665 }
 0x713   :  { %v512_v30 = vadd.f32 1.0, %v1666_v29 }
 0x715   :  { %1667 = vrcp.f32 %v512_v30 }
 0x722   :  { %v1668_v31 = vpop.eup %1667 }
 0x775   :  { %v518_v32 = vpop.permute.xlu1 %517 }
 0x776   :  { %v520_v33 = vmul.f32 %v1668_v31, %v518_v32 }
 0x778   :  { %522 = vrot.lane.b32.xlu0 %v520_v33, %s1703_s23 }
 0x7ea   :  { %v523_v34 = vpop.permute.xlu0 %522 }
 0x7eb   :  { %v525_v35 = vadd.f32 %v523_v34, %v432_v26 }
 0x7ed   :  { %1669 = vtanh.f32 %v525_v35 }
 0x7fa   :  { %v1670_v36 = vpop.eup %1669 }
 0x7fb   :  { %v527_v38 = vsub.f32 %v430_v7, %v1670_v36 }
 0x7fd   :  { %529 = vrot.lane.b32.xlu1 %v527_v38, %s1705_s26 }
 0x86f   :  { %v530_v39 = vpop.permute.xlu1 %529 }
 0x870   :  { %v532_v40 = vmul.f32 %v1668_v31, %v530_v39 }
 0x872   :  { %534 = vrot.lane.b32.xlu0 %v532_v40, %s1706_s27 }
 0x8e4   :  { %v535_v41 = vpop.permute.xlu0 %534 }
 0x8e5   :  { %v537_v42 = vadd.f32 %v1670_v36, %v535_v41 }
 0x8e7   :  { %v539_v43 = vsel %vm538_vm5, %v537_v42, %v430_v7 }
 0x8e8   :  { %543 = vrot.lane.b32.xlu1 %v539_v43, %s1703_s23 }
 0x95a   :  { %v544_v44 = vpop.permute.xlu1 %543 }
 0x95b   :  { %1581 = vmatmul.mubr.msk.f32.vlgmr.msra.gmra.mxu1 %vm60_vm1, %v544_v44 }
 0x95c   :  { %1595 = vmatpush3.msra.mxu1 %v1779_v2  ;;  %1602 = vmatprep.mubr.msk.f32.mxu1 %vm1702_vm0, %v1701_v0 }
 0x95d   :  { %1596 = vmatprep.subr.mxu1 %v1701_v0 }
 0x95e   :  { %1597 = vmatpush3.msra.mxu1 %v1790_v4 }
 0x95f   :  { %1598 = vmatprep.subr.mxu1 %v1701_v0 }
 0x960   :  { %1599 = vmatpush3.msra.mxu1 %v1799_v6 }
 0x961   :  { %1600 = vmatprep.subr.mxu1 %v1701_v0 }
 0x962   :  { %1601 = vmatpush3.msra.mxu1 %v1809_v8 }
 0x963   :  { %1616 = vmatprep.subr.mxu1 %v1701_v0 }
 0xa1b   :  { %v613_v45 = vpop.f32.mrf.mxu1 }
 0xa1c   :  { %v624_v46 = vadd.f32 %v613_v45, %v1847_v12  ;;  %v617_v49 = vadd.f32 %v613_v45, %v541_v48 }
 0xa1d   :  { %v1582_v47 = vpop.f32.mrf.mxu1 }
 0xa1e   :  { %626 = vrot.lane.b32.xlu0 %v624_v46, %s1703_s23  ;;  %v1410_v50 = vmul.f32 -1.442695, %v617_v49 }
 0xa20   :  { %1671 = vpow2.f32 %v1410_v50  ;;  %v868_v50 = vld [vmem:[#allocation2 + $0x30] sm:$0xff] }
 0xa2d   :  { %v1672_v51 = vpop.eup %1671 }
 0xa2e   :  { %v621_v52 = vadd.f32 1.0, %v1672_v51 }
 0xa30   :  { %1673 = vrcp.f32 %v621_v52 }
 0xa3d   :  { %v1674_v53 = vpop.eup %1673 }
 0xa90   :  { %v627_v54 = vpop.permute.xlu0 %626 }
 0xa91   :  { %v629_v55 = vmul.f32 %v1674_v53, %v627_v54 }
 0xa93   :  { %631 = vrot.lane.b32.xlu1 %v629_v55, %s1703_s23 }
 0xb05   :  { %v632_v56 = vpop.permute.xlu1 %631 }
 0xb06   :  { %v634_v57 = vadd.f32 %v632_v56, %v541_v48 }
 0xb08   :  { %1675 = vtanh.f32 %v634_v57 }
 0xb15   :  { %v1676_v58 = vpop.eup %1675 }
 0xb16   :  { %v636_v59 = vsub.f32 %v539_v43, %v1676_v58 }
 0xb18   :  { %638 = vrot.lane.b32.xlu0 %v636_v59, %s1705_s26 }
 0xb8a   :  { %v639_v60 = vpop.permute.xlu0 %638 }
 0xb8b   :  { %v641_v61 = vmul.f32 %v1674_v53, %v639_v60 }
 0xb8d   :  { %643 = vrot.lane.b32.xlu1 %v641_v61, %s1706_s27 }
 0xbff   :  { %v644_v62 = vpop.permute.xlu1 %643 }
 0xc00   :  { %v646_v63 = vadd.f32 %v1676_v58, %v644_v62 }
 0xc02   :  { %v648_v1 = vsel %vm647_vm6, %v646_v63, %v539_v43 }
 0xc03   :  { %652 = vrot.lane.b32.xlu0 %v648_v1, %s1703_s23 }
 0xc75   :  { %v653_v3 = vpop.permute.xlu0 %652 }
 0xc76   :  { %1592 = vmatmul.mubr.msk.f32.vlgmr.msra.gmra.mxu0 %vm60_vm1, %v653_v3 }
 0xc77   :  { %1606 = vmatpush3.msra.mxu0 %v1779_v2  ;;  %1613 = vmatprep.mubr.msk.f32.mxu0 %vm1702_vm0, %v1701_v0 }
 0xc78   :  { %1607 = vmatprep.subr.mxu0 %v1701_v0 }
 0xc79   :  { %1608 = vmatpush3.msra.mxu0 %v1790_v4 }
 0xc7a   :  { %1609 = vmatprep.subr.mxu0 %v1701_v0 }
 0xc7b   :  { %1610 = vmatpush3.msra.mxu0 %v1799_v6 }
 0xc7c   :  { %1611 = vmatprep.subr.mxu0 %v1701_v0 }
 0xc7d   :  { %1612 = vmatpush3.msra.mxu0 %v1809_v8 }
 0xd36   :  { %v722_v5 = vpop.f32.mrf.mxu0 }
 0xd37   :  { %v733_v7 = vadd.f32 %v722_v5, %v1847_v12  ;;  %v726_v11 = vadd.f32 %v722_v5, %v650_v10 }
 0xd38   :  { %v1593_v9 = vpop.f32.mrf.mxu0 }
 0xd39   :  { %735 = vrot.lane.b32.xlu1 %v733_v7, %s1703_s23  ;;  %v1412_v13 = vmul.f32 -1.442695, %v726_v11 }
 0xd3b   :  { %1677 = vpow2.f32 %v1412_v13  ;;  %v977_v13 = vld [vmem:[#allocation2 + $0x38] sm:$0xff] }
 0xd48   :  { %v1678_v14 = vpop.eup %1677 }
 0xd49   :  { %v730_v16 = vadd.f32 1.0, %v1678_v14 }
 0xd4b   :  { %1679 = vrcp.f32 %v730_v16 }
 0xd58   :  { %v1680_v17 = vpop.eup %1679 }
 0xdab   :  { %v736_v18 = vpop.permute.xlu1 %735 }
 0xdac   :  { %v738_v19 = vmul.f32 %v1680_v17, %v736_v18 }
 0xdae   :  { %740 = vrot.lane.b32.xlu0 %v738_v19, %s1703_s23 }
 0xe20   :  { %v741_v20 = vpop.permute.xlu0 %740 }
 0xe21   :  { %v743_v21 = vadd.f32 %v741_v20, %v650_v10 }
 0xe23   :  { %1681 = vtanh.f32 %v743_v21 }
 0xe30   :  { %v1682_v22 = vpop.eup %1681 }
 0xe31   :  { %v745_v23 = vsub.f32 %v648_v1, %v1682_v22 }
 0xe33   :  { %747 = vrot.lane.b32.xlu1 %v745_v23, %s1705_s26 }
 0xea5   :  { %v748_v15 = vpop.permute.xlu1 %747 }
 0xea6   :  { %v750_v24 = vmul.f32 %v1680_v17, %v748_v15 }
 0xea8   :  { %752 = vrot.lane.b32.xlu0 %v750_v24, %s1706_s27  ;;  %v1092_v24 = vld [vmem:[%s2191_s6 + $0x38] sm:$0xff] }
 0xea9   :  { %1134 = vmatprep.subr.mxu0 %v1092_v24 }
 0xf1a   :  { %v753_v25 = vpop.permute.xlu0 %752 }
 0xf1b   :  { %v755_v26 = vadd.f32 %v1682_v22, %v753_v25  ;;  %v1091_v25 = vld [vmem:[%s2191_s6 + $0x30] sm:$0xff] }
 0xf1d   :  { %v757_v27 = vsel %vm756_vm7, %v755_v26, %v648_v1  ;;  %v1090_v26 = vld [vmem:[%s2191_s6 + $0x28] sm:$0xff] }
 0xf1e   :  { %761 = vrot.lane.b32.xlu1 %v757_v27, %s1703_s23 }
 0xf90   :  { %v762_v28 = vpop.permute.xlu1 %761 }
 0xf91   :  { %1603 = vmatmul.mubr.msk.f32.vlgmr.msra.gmra.mxu1 %vm60_vm1, %v762_v28  ;;  %v1088_v28 = vld [vmem:[%s2191_s6 + $0x18] sm:$0xff] }
 0xf92   :  { %1617 = vmatpush3.msra.mxu1 %v1779_v2  ;;  %1624 = vmatprep.mubr.msk.f32.mxu1 %vm1702_vm0, %v1701_v0  ;;  %v759_v2 = vld [vmem:[#allocation2 + $0x28] sm:$0xff] }
 0xf93   :  { %1618 = vmatprep.subr.mxu1 %v1701_v0 }
 0xf94   :  { %1619 = vmatpush3.msra.mxu1 %v1790_v4 }
 0xf95   :  { %1620 = vmatprep.subr.mxu1 %v1701_v0 }
 0xf96   :  { %1621 = vmatpush3.msra.mxu1 %v1799_v6 }
 0xf97   :  { %1622 = vmatprep.subr.mxu1 %v1701_v0 }
 0xf98   :  { %1623 = vmatpush3.msra.mxu1 %v1809_v8 }
0x1051   :  { %v831_v29 = vpop.f32.mrf.mxu1 }
0x1052   :  { %v842_v30 = vadd.f32 %v831_v29, %v1847_v12  ;;  %v835_v32 = vadd.f32 %v831_v29, %v759_v2  ;;  %v1087_v29 = vld [vmem:[%s2191_s6 + $0x10] sm:$0xff] }
0x1053   :  { %v1604_v31 = vpop.f32.mrf.mxu1 }
0x1054   :  { %844 = vrot.lane.b32.xlu0 %v842_v30, %s1703_s23  ;;  %v1414_v33 = vmul.f32 -1.442695, %v835_v32  ;;  %v1086_v30 = vld [vmem:[%s2191_s6 + $0x8] sm:$0xff]  ;;  %v1085_v31 = vld [vmem:[%s2191_s6] sm:$0xff] }
0x1056   :  { %1683 = vpow2.f32 %v1414_v33  ;;  %v1218_v33 = vld [vmem:[%s2192_s8 + $0xf8] sm:$0xff] }
0x1057   :  { %1475 = vmatprep.subr.mxu1 %v1218_v33 }
0x1063   :  { %v1684_v34 = vpop.eup %1683 }
0x1064   :  { %v839_v4 = vadd.f32 1.0, %v1684_v34  ;;  %v1202_v34 = vld [vmem:[%s2192_s8 + $0x78] sm:$0xff] }
0x1066   :  { %1685 = vrcp.f32 %v839_v4  ;;  %v1217_v4 = vld [vmem:[%s2192_s8 + $0xf0] sm:$0xff] }
0x1073   :  { %v1686_v35 = vpop.eup %1685 }
0x10c6   :  { %v845_v36 = vpop.permute.xlu0 %844 }
0x10c7   :  { %v847_v6 = vmul.f32 %v1686_v35, %v845_v36  ;;  %v1216_v36 = vld [vmem:[%s2192_s8 + $0xe8] sm:$0xff] }
0x10c9   :  { %849 = vrot.lane.b32.xlu1 %v847_v6, %s1703_s23  ;;  %v1200_v6 = vld [vmem:[%s2192_s8 + $0x68] sm:$0xff] }
0x113b   :  { %v850_v38 = vpop.permute.xlu1 %849 }
0x113c   :  { %v852_v8 = vadd.f32 %v850_v38, %v759_v2  ;;  %v1215_v38 = vld [vmem:[%s2192_s8 + $0xe0] sm:$0xff] }
0x113e   :  { %1687 = vtanh.f32 %v852_v8  ;;  %v1199_v8 = vld [vmem:[%s2192_s8 + $0x60] sm:$0xff] }
0x114b   :  { %v1688_v39 = vpop.eup %1687 }
0x114c   :  { %v854_v40 = vsub.f32 %v757_v27, %v1688_v39 }
0x114e   :  { %856 = vrot.lane.b32.xlu0 %v854_v40, %s1705_s26  ;;  %v1198_v40 = vld [vmem:[%s2192_s8 + $0x58] sm:$0xff] }
0x11c0   :  { %v857_v41 = vpop.permute.xlu0 %856 }
0x11c1   :  { %v859_v42 = vmul.f32 %v1686_v35, %v857_v41  ;;  %v1201_v35 = vld [vmem:[%s2192_s8 + $0x70] sm:$0xff] }
0x11c3   :  { %861 = vrot.lane.b32.xlu1 %v859_v42, %s1706_s27  ;;  %v1213_v42 = vld [vmem:[%s2192_s8 + $0xd0] sm:$0xff] }
0x1235   :  { %v862_v43 = vpop.permute.xlu1 %861 }
0x1236   :  { %v864_v44 = vadd.f32 %v1688_v39, %v862_v43  ;;  %v1214_v39 = vld [vmem:[%s2192_s8 + $0xd8] sm:$0xff] }
0x1238   :  { %v866_v45 = vsel %vm865_vm8, %v864_v44, %v757_v27  ;;  %v1089_v27 = vld [vmem:[%s2191_s6 + $0x20] sm:$0xff]  ;;  %v1197_v44 = vld [vmem:[%s2192_s8 + $0x50] sm:$0xff] }
0x1239   :  { %870 = vrot.lane.b32.xlu0 %v866_v45, %s1703_s23 }
0x12ab   :  { %v871_v46 = vpop.permute.xlu0 %870 }
0x12ac   :  { %1614 = vmatmul.mubr.msk.f32.vlgmr.msra.gmra.mxu0 %vm60_vm1, %v871_v46 }
0x12ad   :  { %1174 = vmatprep.mubr.f32.mxu0 %v1701_v0  ;;  %1135 = vmatpush1.msra.mxu0 %v1091_v25  ;;  %v1303_v25 = vld [vmem:[%s2193_s10 + $0x20] sm:$0xff] }
0x12ae   :  { %1136 = vmatprep.subr.mxu0 %v1090_v26  ;;  %v1302_v26 = vld [vmem:[%s2193_s10 + $0x18] sm:$0xff] }
0x12af   :  { %1137 = vmatpush1.msra.mxu0 %v1089_v27  ;;  %v1301_v27 = vld [vmem:[%s2193_s10 + $0x10] sm:$0xff] }
0x12b0   :  { %1138 = vmatprep.subr.mxu0 %v1088_v28  ;;  %v1300_v28 = vld [vmem:[%s2193_s10 + $0x8] sm:$0xff] }
0x12b1   :  { %1139 = vmatpush1.msra.mxu0 %v1087_v29  ;;  %v1299_v29 = vld [vmem:[%s2193_s10] sm:$0xff] }
0x12b2   :  { %1140 = vmatprep.subr.mxu0 %v1086_v30 }
0x12b3   :  { %1141 = vmatpush1.msra.mxu0 %v1085_v31  ;;  %v1420_v31 = vld [vmem:[%s2195_s9] ss:$0 sm:$0xff] }
0x12b4   :  { %1627 = vmatprep.subr.mxu0 %v1701_v0 }
0x136c   :  { %v940_v47 = vpop.f32.mrf.mxu0 }
0x136d   :  { %v951_v48 = vadd.f32 %v940_v47, %v1847_v12  ;;  %v944_v51 = vadd.f32 %v940_v47, %v868_v50  ;;  %v1196_v47 = vld [vmem:[%s2192_s8 + $0x48] sm:$0xff] }
0x136e   :  { %v1615_v49 = vpop.f32.mrf.mxu0 }
0x136f   :  { %953 = vrot.lane.b32.xlu1 %v951_v48, %s1703_s23  ;;  %v1416_v52 = vmul.f32 -1.442695, %v944_v51  ;;  %v1211_v48 = vld [vmem:[%s2192_s8 + $0xc0] sm:$0xff]  ;;  %v1210_v49 = vld [vmem:[%s2192_s8 + $0xb8] sm:$0xff]  ;;  %v1209_v51 = vld [vmem:[%s2192_s8 + $0xb0] sm:$0xff] }
0x1371   :  { %1689 = vpow2.f32 %v1416_v52  ;;  %v1193_v52 = vld [vmem:[%s2192_s8 + $0x30] sm:$0xff] }
0x137e   :  { %v1690_v53 = vpop.eup %1689 }
0x137f   :  { %v948_v54 = vadd.f32 1.0, %v1690_v53  ;;  %v1208_v53 = vld [vmem:[%s2192_s8 + $0xa8] sm:$0xff] }
0x1381   :  { %1691 = vrcp.f32 %v948_v54  ;;  %v1192_v54 = vld [vmem:[%s2192_s8 + $0x28] sm:$0xff] }
0x138e   :  { %v1692_v55 = vpop.eup %1691 }
0x13e1   :  { %v954_v56 = vpop.permute.xlu1 %953 }
0x13e2   :  { %v956_v57 = vmul.f32 %v1692_v55, %v954_v56 }
0x13e4   :  { %958 = vrot.lane.b32.xlu0 %v956_v57, %s1703_s23  ;;  %v1191_v57 = vld [vmem:[%s2192_s8 + $0x20] sm:$0xff] }
0x1456   :  { %v959_v58 = vpop.permute.xlu0 %958 }
0x1457   :  { %v961_v59 = vadd.f32 %v959_v58, %v868_v50  ;;  %v1194_v50 = vld [vmem:[%s2192_s8 + $0x38] sm:$0xff] }
0x1458   :  { %v1206_v58 = vld [vmem:[%s2192_s8 + $0x98] sm:$0xff] }
0x1459   :  { %1693 = vtanh.f32 %v961_v59  ;;  %v1190_v59 = vld [vmem:[%s2192_s8 + $0x18] sm:$0xff] }
0x1466   :  { %v1694_v60 = vpop.eup %1693 }
0x1467   :  { %v963_v61 = vsub.f32 %v866_v45, %v1694_v60 }
0x1469   :  { %965 = vrot.lane.b32.xlu1 %v963_v61, %s1705_s26  ;;  %v1189_v61 = vld [vmem:[%s2192_s8 + $0x10] sm:$0xff] }
0x14db   :  { %v966_v62 = vpop.permute.xlu1 %965 }
0x14dc   :  { %v968_v63 = vmul.f32 %v1692_v55, %v966_v62  ;;  %v1207_v55 = vld [vmem:[%s2192_s8 + $0xa0] sm:$0xff]  ;;  %v1204_v62 = vld [vmem:[%s2192_s8 + $0x88] sm:$0xff] }
0x14de   :  { %970 = vrot.lane.b32.xlu0 %v968_v63, %s1706_s27  ;;  %v1188_v63 = vld [vmem:[%s2192_s8 + $0x8] sm:$0xff] }
0x1550   :  { %v971_v1 = vpop.permute.xlu0 %970 }
0x1551   :  { %v973_v3 = vadd.f32 %v1694_v60, %v971_v1  ;;  %v1205_v60 = vld [vmem:[%s2192_s8 + $0x90] sm:$0xff]  ;;  %v1203_v1 = vld [vmem:[%s2192_s8 + $0x80] sm:$0xff] }
0x1553   :  { %v2004_v5 = vsel %vm974_vm9, %v973_v3, %v866_v45  ;;  %v1212_v45 = vld [vmem:[%s2192_s8 + $0xc8] sm:$0xff]  ;;  %v1187_v3 = vld [vmem:[%s2192_s8] sm:$0xff] }
0x1554   :  { %979 = vrot.lane.b32.xlu1 %v2004_v5, %s1703_s23 }
0x15c6   :  { %v980_v7 = vpop.permute.xlu1 %979 }
0x15c7   :  { %1625 = vmatmul.mubr.msk.f32.vlgmr.msra.gmra.mxu1 %vm60_vm1, %v980_v7  ;;  %v1305_v7 = vld [vmem:[%s2193_s10 + $0x30] sm:$0xff] }
0x15c8   :  { %1476 = vmatpush3.msra.mxu1 %v1202_v34 }
0x15c9   :  { %1477 = vmatprep.subr.mxu1 %v1217_v4 }
0x15ca   :  { %1478 = vmatpush3.msra.mxu1 %v1201_v35  ;;  %v1421_v35 = vld [vmem:[%s2196_s11] ss:$0 sm:$0xff] }
0x15cb   :  { %1479 = vmatprep.subr.mxu1 %v1216_v36 }
0x15cc   :  { %1480 = vmatpush3.msra.mxu1 %v1200_v6 }
0x15cd   :  { %1481 = vmatprep.subr.mxu1 %v1215_v38 }
0x15ce   :  { %1482 = vmatpush3.msra.mxu1 %v1199_v8 }
0x15cf   :  { %1483 = vmatprep.subr.mxu1 %v1214_v39 }
0x15d0   :  { %1484 = vmatpush3.msra.mxu1 %v1198_v40 }
0x15d1   :  { %1485 = vmatprep.subr.mxu1 %v1213_v42 }
0x15d2   :  { %1486 = vmatpush3.msra.mxu1 %v1197_v44 }
0x15d3   :  { %1487 = vmatprep.subr.mxu1 %v1212_v45 }
0x15d4   :  { %1488 = vmatpush3.msra.mxu1 %v1196_v47 }
0x15d5   :  { %1489 = vmatprep.subr.mxu1 %v1211_v48 }
0x15d6   :  { %1490 = vmatpush3.msra.mxu1 %v1195_v37 }
0x15d7   :  { %1491 = vmatprep.subr.mxu1 %v1210_v49 }
0x15d8   :  { %1492 = vmatpush3.msra.mxu1 %v1194_v50 }
0x15d9   :  { %1493 = vmatprep.subr.mxu1 %v1209_v51 }
0x15da   :  { %1494 = vmatpush3.msra.mxu1 %v1193_v52 }
0x15db   :  { %1495 = vmatprep.subr.mxu1 %v1208_v53 }
0x15dc   :  { %1496 = vmatpush3.msra.mxu1 %v1192_v54 }
0x15dd   :  { %1497 = vmatprep.subr.mxu1 %v1207_v55 }
0x15de   :  { %1498 = vmatpush3.msra.mxu1 %v1191_v57 }
0x15df   :  { %1499 = vmatprep.subr.mxu1 %v1206_v58 }
0x15e0   :  { %1500 = vmatpush3.msra.mxu1 %v1190_v59 }
0x15e1   :  { %1501 = vmatprep.subr.mxu1 %v1205_v60 }
0x15e2   :  { %1502 = vmatpush3.msra.mxu1 %v1189_v61 }
0x15e3   :  { %1503 = vmatprep.subr.mxu1 %v1204_v62 }
0x15e4   :  { %1504 = vmatpush3.msra.mxu1 %v1188_v63 }
0x15e5   :  { %1505 = vmatprep.subr.mxu1 %v1203_v1 }
0x15e6   :  { %1506 = vmatpush3.msra.mxu1 %v1187_v3 }
0x1687   :  { %v1049_v9 = vpop.f32.mrf.mxu1 }
0x1688   :  { %v1060_v10 = vadd.f32 %v1049_v9, %v1847_v12  ;;  %v1053_v14 = vadd.f32 %v1049_v9, %v977_v13  ;;  %v1304_v9 = vld [vmem:[%s2193_s10 + $0x28] sm:$0xff] }
0x1689   :  { %v1626_v11 = vpop.f32.mrf.mxu1 }
0x168a   :  { %1062 = vrot.lane.b32.xlu0 %v1060_v10, %s1703_s23  ;;  %v1418_v16 = vmul.f32 -1.442695, %v1053_v14  ;;  %v1095_v10 = vlaneseq  ;;  %v1093_v14 = vld [vmem:[%s2194_s7] sm:$0x3] }
0x168c   :  { %1695 = vpow2.f32 %v1418_v16  ;;  %v1096_v11 = vshrl.u32 %v1095_v10, 7 }
0x168e   :  { %v1101_v16 = vsub.s32 1, %v1096_v11 }
0x1699   :  { %v1696_v17 = vpop.eup %1695 }
0x169a   :  { %v1057_v18 = vadd.f32 1.0, %v1696_v17 }
0x169c   :  { %1697 = vrcp.f32 %v1057_v18  ;;  %v1102_v18 = vrot.slane %v1093_v14, %v1101_v16 }
0x16a9   :  { %v1698_v19 = vpop.eup %1697 }
0x16fc   :  { %v1063_v20 = vpop.permute.xlu0 %1062 }
0x16fd   :  { %v1065_v21 = vmul.f32 %v1698_v19, %v1063_v20 }
0x16ff   :  { %1067 = vrot.lane.b32.xlu1 %v1065_v21, %s1703_s23 }
0x1771   :  { %v1068_v22 = vpop.permute.xlu1 %1067 }
0x1772   :  { %v1070_v23 = vadd.f32 %v1068_v22, %v977_v13  ;;  %v1097_v13 = vsub.s32 0, %v1096_v11 }
0x1774   :  { %1699 = vtanh.f32 %v1070_v23  ;;  %v1098_v17 = vrot.slane %v1093_v14, %v1097_v13 }
0x1781   :  { %v1700_v15 = vpop.eup %1699 }
0x1782   :  { %v1072_v12 = vsub.f32 %v2004_v5, %v1700_v15 }
0x1784   :  { %1074 = vrot.lane.b32.xlu0 %v1072_v12, %s1705_s26 }
0x17f6   :  { %v1075_v2 = vpop.permute.xlu0 %1074 }
0x17f7   :  { %v1077_v32 = vmul.f32 %v1698_v19, %v1075_v2 }
0x17f9   :  { %1079 = vrot.lane.b32.xlu1 %v1077_v32, %s1706_s27 }
0x186b   :  { %v1080_v41 = vpop.permute.xlu1 %1079 }
0x186c   :  { %v1082_v43 = vadd.f32 %v1700_v15, %v1080_v41 }
0x186e   :  { %v1084_v46 = vsel %vm1083_vm10, %v1082_v43, %v2004_v5  ;;  %v1306_v5 = vld [vmem:[%s2193_s10 + $0x38] sm:$0xff] }
0x186f   :  { %1106 = vrot.lane.b32.xlu0 %v1084_v46, %s1703_s23 }
0x18e1   :  { %v1107_v56 = vpop.permute.xlu0 %1106 }
0x18e2   :  { %1419 = vmatmul.mubr.msk.f32.vlgmr.msra.gmra.mxu0 %vm60_vm1, %v1107_v56 }
0x18e3   :  { %1643 = vmatprep.mubr.msk.f32.mxu0 %vm1702_vm0, %v1701_v0  ;;  %1628 = vmatpush3.msra.mxu0 %v1306_v5 }
0x18e4   :  { %1629 = vmatprep.subr.mxu0 %v1701_v0 }
0x18e5   :  { %1630 = vmatpush3.msra.mxu0 %v1305_v7 }
0x18e6   :  { %1631 = vmatprep.subr.mxu0 %v1701_v0 }
0x18e7   :  { %1632 = vmatpush3.msra.mxu0 %v1304_v9 }
0x18e8   :  { %1633 = vmatprep.subr.mxu0 %v1701_v0 }
0x18e9   :  { %1634 = vmatpush3.msra.mxu0 %v1303_v25 }
0x18ea   :  { %1635 = vmatprep.subr.mxu0 %v1701_v0 }
0x18eb   :  { %1636 = vmatpush3.msra.mxu0 %v1302_v26 }
0x18ec   :  { %1637 = vmatprep.subr.mxu0 %v1701_v0 }
0x18ed   :  { %1638 = vmatpush3.msra.mxu0 %v1301_v27 }
0x18ee   :  { %1639 = vmatprep.subr.mxu0 %v1701_v0 }
0x18ef   :  { %1640 = vmatpush3.msra.mxu0 %v1300_v28 }
0x18f0   :  { %1641 = vmatprep.subr.mxu0 %v1701_v0 }
0x18f1   :  { %1642 = vmatpush3.msra.mxu0 %v1299_v29 }
0x19a2   :  { %v1176_v19 = vpop.f32.mrf.mxu0 }
0x19a3   :  { %v1177_v20 = vadd.f32 %v1176_v19, %v1098_v17 }
0x19a4   :  { %v1178_v21 = vpop.f32.mrf.mxu0 }
0x19a5   :  { %v1179_v22 = vadd.f32 %v1178_v21, %v1102_v18  ;;  %v1183_v23 = vmul.f32 0.01, %v1177_v20  ;;  %vm1181_vm11 = vcmp.gt.f32.partialorder %v1177_v20, 0.0 }
0x19a7   :  { %v1184_v15 = vmul.f32 0.01, %v1179_v22  ;;  %vm1182_vm12 = vcmp.gt.f32.partialorder %v1179_v22, 0.0  ;;  %v1185_v24 = vsel %vm1181_vm11, %v1177_v20, %v1183_v23 }
0x19a9   :  { %v1186_v12 = vsel %vm1182_vm12, %v1179_v22, %v1184_v15 }
0x19aa   :  { %1290 = vmatprep.mubr.f32.mxu1 %v1186_v12 }
0x19ab   :  { %1291 = vmatmul.mubr.f32.vlgmr.msra.gmra.mxu1 %v1185_v24 }
0x1a6b   :  { %v1507_v30 = vpop.f32.mrf.mxu1 }
0x1a6d   :  { %v1508_v2 = vpop.f32.mrf.mxu1 }
0x1a6e   :  { %v1509_v32 = vadd.f32 %v1508_v2, %v1507_v30 }
0x1a70   :  { %v1293_v33 = vadd.f32 %v1509_v32, %v1420_v31 }
0x1a72   :  { %vm1296_vm13 = vcmp.gt.f32.partialorder %v1293_v33, 0.0  ;;  %v1297_v34 = vmul.f32 0.01, %v1293_v33 }
0x1a74   :  { %v1298_v4 = vsel %vm1296_vm13, %v1293_v33, %v1297_v34 }
0x1a75   :  { %1644 = vmatmul.mubr.msk.f32.vlgmr.msra.gmra.mxu0 %vm1314_vm14, %v1298_v4 }
0x1b35   :  { %v1384_v36 = vpop.f32.mrf.mxu0 }
0x1b36   :  { %v1385_v0 = vadd.f32 %v1421_v35, %v1384_v36 }
0x1b37   :  { %v1645_v6 = vpop.f32.mrf.mxu0 }
0x1b38   :  { %1389 = vst.msk [vmem:[%s2197_s12] sm:$0xff] %vm1388_vm15, %v1385_v0 }

</bundles_post_ra>
